<compile_context>
chip_gen: v7x
topology: tpu7x:2x2x1
jax: 0.10.0
libtpu: 0.0.40
codegen_flags: <defaults>
</compile_context>

<pallas_src>
import math

import numpy as np
import jax
import jax.numpy as jnp
from jax.experimental import pallas as pl
from jax.experimental.pallas import tpu as pltpu

# ----------------------------- configuration ------------------------------
EMBED_DIM = 16
IN_DIM = 3
HIDDEN_DIM = 32
N_LAYERS_BEFORE_SKIP = 2
N_LAYERS_AFTER_SKIP = 2
OUT_DIM = 4                          # rgb (3) + density (1)
N_FREQS = 4                          # frequency encoding levels
FREQ_DIM = IN_DIM * N_FREQS          # 12
COORDS_DIM = 2 * FREQ_DIM            # 24 (12 sin + 12 cos)
D_IN = EMBED_DIM + COORDS_DIM        # 40 = input width to in_layer / skip_proj
TM_MAX = 2048                        # max points (lanes) per grid step

# Frequency-expansion matrix (feature-major):
#   phases = _ENC_A @ c_norm_T + _ENC_OFF,   phases[k*3+j, :]          = 2^k*pi * x_j
#                                            phases[12+k*3+j, :] + pi/2 -> cos rows
_ENC_A = np.zeros((COORDS_DIM, IN_DIM), np.float32)
_ENC_OFF = np.zeros((COORDS_DIM, 1), np.float32)
for _k in range(N_FREQS):
    for _j in range(IN_DIM):
        _ENC_A[_k * IN_DIM + _j, _j] = (2.0 ** _k) * math.pi
        _ENC_A[FREQ_DIM + _k * IN_DIM + _j, _j] = (2.0 ** _k) * math.pi
_ENC_OFF[FREQ_DIM:, 0] = math.pi / 2.0


# ------------------------------- the kernel -------------------------------
def _decoder_kernel(coords_ref, bias_ref, amin_ref, amax_ref,
                    enc_a_ref, enc_off_ref, w_enc_ref,
                    w_before_ref, b_before_ref, w_after_ref, b_after_ref,
                    w_out_ref, b_out_ref, out_ref):
    f32 = jnp.float32

    # --- aabb normalization (feature-major: (3, TM)) --------------------------
    c = coords_ref[...]                                   # (3, TM)
    amin = amin_ref[...]                                  # (3, 1)
    amax = amax_ref[...]                                  # (3, 1)
    c_norm = (c - amin) / (amax - amin)                   # (3, TM)

    # --- selector: all coords strictly inside (0, 1) --------------------------
    ins = jnp.where(jnp.logical_and(c_norm > 0.0, c_norm < 1.0), 1.0, 0.0)  # (3, TM)
    selector = ins[0:1, :] * ins[1:2, :] * ins[2:3, :]                      # (1, TM)

    # --- frequency encoding: rows 0..11 sin(2^k*pi*x), rows 12..23 cos via +pi/2
    phases = (jnp.dot(enc_a_ref[...], c_norm, preferred_element_type=f32)
              + enc_off_ref[...])                         # (24, TM)
    enc = jnp.sin(phases)                                 # (24, TM)

    # --- fused [in_layer | skip_proj]; embedding term is baked into bias_ref --
    pre = (jnp.dot(w_enc_ref[...], enc, preferred_element_type=f32)
           + bias_ref[...])                               # (64, TM)
    h = jax.nn.relu(pre[:HIDDEN_DIM, :])                  # in_layer output  (32, TM)
    skip = jax.nn.relu(pre[HIDDEN_DIM:, :])               # skip_proj output (32, TM)

    # --- MLP trunk -------------------------------------------------------------
    for l in range(N_LAYERS_BEFORE_SKIP):
        h = jax.nn.relu(jnp.dot(w_before_ref[l], h, preferred_element_type=f32)
                        + b_before_ref[l])
    h = h + skip
    for l in range(N_LAYERS_AFTER_SKIP):
        h = jax.nn.relu(jnp.dot(w_after_ref[l], h, preferred_element_type=f32)
                        + b_after_ref[l])
    out = jnp.dot(w_out_ref[...], h, preferred_element_type=f32) + b_out_ref[...]  # (4, TM)

    # --- heads: rows 0..2 -> sigmoid(rgb), row 3 -> trunc_exp(density) * selector
    rgb = 1.0 / (1.0 + jnp.exp(-out))                     # cheap to do on all 4 rows
    # trunc_exp forward == exp; clamp only guards f32 overflow.
    density = jnp.exp(jnp.minimum(out - 1.0, 80.0)) * selector
    row = jax.lax.broadcasted_iota(jnp.int32, out.shape, 0)
    out_ref[...] = jnp.where(row < 3, rgb, density)       # lane-dense (4, TM) store


# ------------------------------- the wrapper -------------------------------
def _round_up(x, m):
    return -(-x // m) * m


def _rep_spec(shape):
    """BlockSpec covering the whole (small, replicated) array at every grid step."""
    nd = len(shape)
    return pl.BlockSpec(shape, lambda b, i, _nd=nd: (0,) * _nd)


@jax.jit
def implicit_decoder_forward(params, embeddings, coords):
    """embeddings: (B, 16) f32;  coords: (B, N, 3) f32 -> (rgb (B,N,3), density (B,N,1))."""
    B, N, _ = coords.shape
    if N == 0:
        return (jnp.zeros((B, 0, 3), jnp.float32), jnp.zeros((B, 0, 1), jnp.float32))

    tm = min(TM_MAX, _round_up(N, 128))
    n_pad = _round_up(N, tm)

    # Layout plumbing: put the point axis on lanes.
    coords_t = jnp.swapaxes(coords.astype(jnp.float32), 1, 2)           # (B, 3, N)
    if n_pad != N:
        coords_t = jnp.pad(coords_t, ((0, 0), (0, 0), (0, n_pad - N)))  # (B, 3, N_pad)

    # Fuse [in_layer | skip_proj]; fold the per-batch embedding term into a bias column.
    w_fused = jnp.concatenate([params["w_in"], params["w_skip"]], axis=1)    # (40, 64)
    b_fused = jnp.concatenate([params["b_in"], params["b_skip"]], axis=1)    # (1, 64)
    bias = embeddings.astype(jnp.float32) @ w_fused[:EMBED_DIM] + b_fused    # (B, 64)
    bias_col = bias[:, :, None]                                              # (B, 64, 1)
    w_enc_t = w_fused[EMBED_DIM:].T                                          # (64, 24)

    w_before_t = jnp.swapaxes(params["w_before"], 1, 2)   # (L, 32, 32)
    b_before_t = jnp.swapaxes(params["b_before"], 1, 2)   # (L, 32, 1)
    w_after_t = jnp.swapaxes(params["w_after"], 1, 2)     # (L, 32, 32)
    b_after_t = jnp.swapaxes(params["b_after"], 1, 2)     # (L, 32, 1)
    w_out_t = params["w_out"].T                            # (4, 32)
    b_out_t = params["b_out"].T                            # (4, 1)
    amin_col = params["aabb_min"].T                        # (3, 1)
    amax_col = params["aabb_max"].T                        # (3, 1)

    grid = (B, n_pad // tm)

    in_specs = [
        pl.BlockSpec((None, IN_DIM, tm), lambda b, i: (b, 0, i)),            # coords (3, TM)
        pl.BlockSpec((None, 2 * HIDDEN_DIM, 1), lambda b, i: (b, 0, 0)),     # per-batch bias col
        _rep_spec((IN_DIM, 1)),                                              # aabb_min
        _rep_spec((IN_DIM, 1)),                                              # aabb_max
        _rep_spec((COORDS_DIM, IN_DIM)),                                     # enc expansion A
        _rep_spec((COORDS_DIM, 1)),                                          # enc phase offsets
        _rep_spec((2 * HIDDEN_DIM, COORDS_DIM)),                             # fused enc weights^T
        _rep_spec((N_LAYERS_BEFORE_SKIP, HIDDEN_DIM, HIDDEN_DIM)),           # w_before^T
        _rep_spec((N_LAYERS_BEFORE_SKIP, HIDDEN_DIM, 1)),                    # b_before^T
        _rep_spec((N_LAYERS_AFTER_SKIP, HIDDEN_DIM, HIDDEN_DIM)),            # w_after^T
        _rep_spec((N_LAYERS_AFTER_SKIP, HIDDEN_DIM, 1)),                     # b_after^T
        _rep_spec((OUT_DIM, HIDDEN_DIM)),                                    # w_out^T
        _rep_spec((OUT_DIM, 1)),                                             # b_out^T
    ]
    out_spec = pl.BlockSpec((None, OUT_DIM, tm), lambda b, i: (b, 0, i))
    out_shape = jax.ShapeDtypeStruct((B, OUT_DIM, n_pad), jnp.float32)

    fused_out = pl.pallas_call(
        _decoder_kernel,
        out_shape=out_shape,
        grid_spec=pltpu.PrefetchScalarGridSpec(
            num_scalar_prefetch=0,
            grid=grid,
            in_specs=in_specs,
            out_specs=out_spec,
        ),
        compiler_params=pltpu.CompilerParams(
            dimension_semantics=("parallel", "parallel")),
    )(coords_t, bias_col, amin_col, amax_col,
      jnp.asarray(_ENC_A), jnp.asarray(_ENC_OFF), w_enc_t,
      w_before_t, b_before_t, w_after_t, b_after_t,
      w_out_t, b_out_t)

    rgb = jnp.swapaxes(fused_out[:, :3, :N], 1, 2)        # (B, N, 3)
    density = jnp.swapaxes(fused_out[:, 3:4, :N], 1, 2)   # (B, N, 1)
    return rgb, density


# --------------------------- deterministic params ---------------------------
def init_params(key):
    """Feature layout consumed by w_in/w_skip rows:
       [0:16]  embedding, [16:28] sin(2^k*pi*x) (k-major, xyz-minor), [28:40] cos(...)."""
    ks = jax.random.split(key, 12)

    def lin(k, fan_in, fan_out):
        bound = 1.0 / math.sqrt(fan_in)
        kw, kb = jax.random.split(k)
        w = jax.random.uniform(kw, (fan_in, fan_out), jnp.float32, -bound, bound)
        b = jax.random.uniform(kb, (1, fan_out), jnp.float32, -bound, bound)
        return w, b

    w_in, b_in = lin(ks[0], D_IN, HIDDEN_DIM)
    w_skip, b_skip = lin(ks[1], D_IN, HIDDEN_DIM)

    wb, bb = [], []
    for l in range(N_LAYERS_BEFORE_SKIP):
        w, b = lin(ks[2 + l], HIDDEN_DIM, HIDDEN_DIM)
        wb.append(w); bb.append(b)
    wa, ba = [], []
    for l in range(N_LAYERS_AFTER_SKIP):
        w, b = lin(ks[6 + l], HIDDEN_DIM, HIDDEN_DIM)
        wa.append(w); ba.append(b)
    w_out, b_out = lin(ks[10], HIDDEN_DIM, OUT_DIM)

    aabb = jnp.array([-1.0, -1.0, -1.0, 1.0, 1.0, 1.0], jnp.float32)
    return dict(
        w_in=w_in, b_in=b_in, w_skip=w_skip, b_skip=b_skip,
        w_before=jnp.stack(wb), b_before=jnp.stack(bb),
        w_after=jnp.stack(wa), b_after=jnp.stack(ba),
        w_out=w_out, b_out=b_out,
        aabb_min=aabb[:3].reshape(1, 3), aabb_max=aabb[3:].reshape(1, 3),
    )


# ---------------------------- pure-JAX reference ----------------------------
def _reference_forward(params, embeddings, coords):
    B, N, _ = coords.shape
    amin, amax = params["aabb_min"], params["aabb_max"]
    c = (coords - amin) / (amax - amin)
    selector = ((c > 0.0) & (c < 1.0)).all(axis=-1, keepdims=True).astype(jnp.float32)
    a_sin = jnp.asarray(_ENC_A[:FREQ_DIM]).T                       # (3, 12)
    phases = jnp.einsum("bnj,jf->bnf", c, a_sin)
    enc = jnp.concatenate([jnp.sin(phases), jnp.cos(phases)], axis=-1)
    emb = jnp.broadcast_to(embeddings[:, None, :], (B, N, EMBED_DIM))
    feat = jnp.concatenate([emb, enc], axis=-1)

    def lin(x, w, b):
        return x @ w + b

    h = jax.nn.relu(lin(feat, params["w_in"], params["b_in"]))
    for l in range(N_LAYERS_BEFORE_SKIP):
        h = jax.nn.relu(lin(h, params["w_before"][l], params["b_before"][l]))
    skip = jax.nn.relu(lin(feat, params["w_skip"], params["b_skip"]))
    h = h + skip
    for l in range(N_LAYERS_AFTER_SKIP):
        h = jax.nn.relu(lin(h, params["w_after"][l], params["b_after"][l]))
    out = lin(h, params["w_out"], params["b_out"])
    rgb = jax.nn.sigmoid(out[..., :3])
    density = jnp.exp(out[..., 3:4] - 1.0) * selector
    return rgb, density


# ----------------------------------- main -----------------------------------
if __name__ == "__main__":
    key = jax.random.PRNGKey(0)
    k_params, k_emb, k_coords = jax.random.split(key, 3)

    params = init_params(k_params)

    B, N = 2, 256
    embeddings = jax.random.normal(k_emb, (B, EMBED_DIM), jnp.float32)
    # coords in roughly [-1.5, 1.5] so some points fall outside the aabb (selector test)
    coords = jax.random.uniform(k_coords, (B, N, IN_DIM), jnp.float32, -1.5, 1.5)

    rgb, density = implicit_decoder_forward(params, embeddings, coords)
    jax.block_until_ready((rgb, density))

    assert rgb.shape == (B, N, 3) and density.shape == (B, N, 1)
    assert bool(jnp.all(jnp.isfinite(rgb))) and bool(jnp.all(jnp.isfinite(density)))

    rgb_ref, dens_ref = _reference_forward(params, embeddings, coords)
    np.testing.assert_allclose(np.asarray(rgb), np.asarray(rgb_ref), rtol=2e-3, atol=2e-3)
    np.testing.assert_allclose(np.asarray(density), np.asarray(dens_ref), rtol=2e-3, atol=2e-3)

    print("KERNEL_OK")
</pallas_src>

<mosaic_0001>
module attributes {stable_mosaic.version = 11 : i64} {
  func.func @_decoder_kernel(%arg0: i32, %arg1: i32, %arg2: memref<1x3x256xf32, #tpu.memory_space<vmem>>, %arg3: memref<1x64x1xf32, #tpu.memory_space<vmem>>, %arg4: memref<3x1xf32, #tpu.memory_space<vmem>>, %arg5: memref<3x1xf32, #tpu.memory_space<vmem>>, %arg6: memref<24x3xf32, #tpu.memory_space<vmem>>, %arg7: memref<24x1xf32, #tpu.memory_space<vmem>>, %arg8: memref<64x24xf32, #tpu.memory_space<vmem>>, %arg9: memref<2x32x32xf32, #tpu.memory_space<vmem>>, %arg10: memref<2x32x1xf32, #tpu.memory_space<vmem>>, %arg11: memref<2x32x32xf32, #tpu.memory_space<vmem>>, %arg12: memref<2x32x1xf32, #tpu.memory_space<vmem>>, %arg13: memref<4x32xf32, #tpu.memory_space<vmem>>, %arg14: memref<4x1xf32, #tpu.memory_space<vmem>>, %arg15: memref<1x4x256xf32, #tpu.memory_space<vmem>>) attributes {dimension_semantics = [#tpu.dimension_semantics<parallel>, #tpu.dimension_semantics<parallel>], iteration_bounds = array<i64: 2, 1>, scalar_prefetch = 0 : i64, scratch_operands = 0 : i64, tpu.core_type = #tpu.core_type<tc>, window_params = [{transform_indices = @transform_0, window_bounds = array<i64: 1, 3, 256>}, {transform_indices = @transform_1, window_bounds = array<i64: 1, 64, 1>}, {pipeline_mode = #tpu.pipeline_mode<synchronous>, transform_indices = @transform_2, window_bounds = array<i64: 3, 1>}, {pipeline_mode = #tpu.pipeline_mode<synchronous>, transform_indices = @transform_3, window_bounds = array<i64: 3, 1>}, {pipeline_mode = #tpu.pipeline_mode<synchronous>, transform_indices = @transform_4, window_bounds = array<i64: 24, 3>}, {pipeline_mode = #tpu.pipeline_mode<synchronous>, transform_indices = @transform_5, window_bounds = array<i64: 24, 1>}, {pipeline_mode = #tpu.pipeline_mode<synchronous>, transform_indices = @transform_6, window_bounds = array<i64: 64, 24>}, {pipeline_mode = #tpu.pipeline_mode<synchronous>, transform_indices = @transform_7, window_bounds = array<i64: 2, 32, 32>}, {pipeline_mode = #tpu.pipeline_mode<synchronous>, transform_indices = @transform_8, window_bounds = array<i64: 2, 32, 1>}, {pipeline_mode = #tpu.pipeline_mode<synchronous>, transform_indices = @transform_9, window_bounds = array<i64: 2, 32, 32>}, {pipeline_mode = #tpu.pipeline_mode<synchronous>, transform_indices = @transform_10, window_bounds = array<i64: 2, 32, 1>}, {pipeline_mode = #tpu.pipeline_mode<synchronous>, transform_indices = @transform_11, window_bounds = array<i64: 4, 32>}, {pipeline_mode = #tpu.pipeline_mode<synchronous>, transform_indices = @transform_12, window_bounds = array<i64: 4, 1>}, {transform_indices = @transform_13, window_bounds = array<i64: 1, 4, 256>}]} {
    %c0 = arith.constant 0 : index
    %c0_0 = arith.constant 0 : index
    %c0_1 = arith.constant 0 : index
    %0 = vector.load %arg2[%c0, %c0_0, %c0_1] : memref<1x3x256xf32, #tpu.memory_space<vmem>>, vector<1x3x256xf32>
    %1 = vector.shape_cast %0 : vector<1x3x256xf32> to vector<3x256xf32>
    %c0_2 = arith.constant 0 : index
    %c0_3 = arith.constant 0 : index
    %2 = vector.load %arg4[%c0_2, %c0_3] : memref<3x1xf32, #tpu.memory_space<vmem>>, vector<3x1xf32>
    %c0_4 = arith.constant 0 : index
    %c0_5 = arith.constant 0 : index
    %3 = vector.load %arg5[%c0_4, %c0_5] : memref<3x1xf32, #tpu.memory_space<vmem>>, vector<3x1xf32>
    %4 = vector.broadcast %2 : vector<3x1xf32> to vector<3x256xf32>
    %5 = arith.subf %1, %4 : vector<3x256xf32>
    %6 = arith.subf %3, %2 : vector<3x1xf32>
    %7 = vector.broadcast %6 : vector<3x1xf32> to vector<3x256xf32>
    %8 = arith.divf %5, %7 : vector<3x256xf32>
    %cst = arith.constant 0.000000e+00 : f32
    %9 = vector.broadcast %cst : f32 to vector<3x256xf32>
    %10 = arith.cmpf ogt, %8, %9 : vector<3x256xf32>
    %cst_6 = arith.constant 1.000000e+00 : f32
    %11 = vector.broadcast %cst_6 : f32 to vector<3x256xf32>
    %12 = arith.cmpf olt, %8, %11 : vector<3x256xf32>
    %13 = arith.andi %10, %12 : vector<3x256xi1>
    %cst_7 = arith.constant 1.000000e+00 : f32
    %cst_8 = arith.constant 0.000000e+00 : f32
    %14 = vector.broadcast %cst_7 : f32 to vector<3x256xf32>
    %15 = vector.broadcast %cst_8 : f32 to vector<3x256xf32>
    %16 = arith.select %13, %14, %15 : vector<3x256xi1>, vector<3x256xf32>
    %17 = vector.extract_strided_slice %16 {offsets = [0, 0], sizes = [1, 256], strides = [1, 1]} : vector<3x256xf32> to vector<1x256xf32>
    %18 = vector.extract_strided_slice %16 {offsets = [1, 0], sizes = [1, 256], strides = [1, 1]} : vector<3x256xf32> to vector<1x256xf32>
    %19 = arith.mulf %17, %18 : vector<1x256xf32>
    %20 = vector.extract_strided_slice %16 {offsets = [2, 0], sizes = [1, 256], strides = [1, 1]} : vector<3x256xf32> to vector<1x256xf32>
    %21 = arith.mulf %19, %20 : vector<1x256xf32>
    %c0_9 = arith.constant 0 : index
    %c0_10 = arith.constant 0 : index
    %22 = vector.load %arg6[%c0_9, %c0_10] : memref<24x3xf32, #tpu.memory_space<vmem>>, vector<24x3xf32>
    %cst_11 = arith.constant dense<0.000000e+00> : vector<24x256xf32>
    %23 = tpu.matmul %22, %8, %cst_11 {dimension_numbers = #tpu.dot_dimension_numbers<[1], [0], [0], [1], [0, 0, 1, 1], [], []>} : vector<24x3xf32>, vector<3x256xf32>, vector<24x256xf32> -> vector<24x256xf32>
    %c0_12 = arith.constant 0 : index
    %c0_13 = arith.constant 0 : index
    %24 = vector.load %arg7[%c0_12, %c0_13] : memref<24x1xf32, #tpu.memory_space<vmem>>, vector<24x1xf32>
    %25 = vector.broadcast %24 : vector<24x1xf32> to vector<24x256xf32>
    %26 = arith.addf %23, %25 : vector<24x256xf32>
    %27 = math.sin %26 : vector<24x256xf32>
    %c0_14 = arith.constant 0 : index
    %c0_15 = arith.constant 0 : index
    %28 = vector.load %arg8[%c0_14, %c0_15] : memref<64x24xf32, #tpu.memory_space<vmem>>, vector<64x24xf32>
    %cst_16 = arith.constant dense<0.000000e+00> : vector<64x256xf32>
    %29 = tpu.matmul %28, %27, %cst_16 {dimension_numbers = #tpu.dot_dimension_numbers<[1], [0], [0], [1], [0, 0, 1, 1], [], []>} : vector<64x24xf32>, vector<24x256xf32>, vector<64x256xf32> -> vector<64x256xf32>
    %c0_17 = arith.constant 0 : index
    %c0_18 = arith.constant 0 : index
    %c0_19 = arith.constant 0 : index
    %30 = vector.load %arg3[%c0_17, %c0_18, %c0_19] : memref<1x64x1xf32, #tpu.memory_space<vmem>>, vector<1x64x1xf32>
    %31 = vector.shape_cast %30 : vector<1x64x1xf32> to vector<64x1xf32>
    %32 = vector.broadcast %31 : vector<64x1xf32> to vector<64x256xf32>
    %33 = arith.addf %29, %32 : vector<64x256xf32>
    %34 = vector.extract_strided_slice %33 {offsets = [0, 0], sizes = [32, 256], strides = [1, 1]} : vector<64x256xf32> to vector<32x256xf32>
    %cst_20 = arith.constant 0.000000e+00 : f32
    %35 = vector.broadcast %cst_20 : f32 to vector<32x256xf32>
    %36 = arith.maximumf %34, %35 : vector<32x256xf32>
    %37 = vector.extract_strided_slice %33 {offsets = [32, 0], sizes = [32, 256], strides = [1, 1]} : vector<64x256xf32> to vector<32x256xf32>
    %cst_21 = arith.constant 0.000000e+00 : f32
    %38 = vector.broadcast %cst_21 : f32 to vector<32x256xf32>
    %39 = arith.maximumf %37, %38 : vector<32x256xf32>
    %c0_22 = arith.constant 0 : index
    %c0_23 = arith.constant 0 : index
    %c0_24 = arith.constant 0 : index
    %40 = vector.load %arg9[%c0_22, %c0_23, %c0_24] : memref<2x32x32xf32, #tpu.memory_space<vmem>>, vector<1x32x32xf32>
    %41 = vector.shape_cast %40 : vector<1x32x32xf32> to vector<32x32xf32>
    %cst_25 = arith.constant dense<0.000000e+00> : vector<32x256xf32>
    %42 = tpu.matmul %41, %36, %cst_25 {dimension_numbers = #tpu.dot_dimension_numbers<[1], [0], [0], [1], [0, 0, 1, 1], [], []>} : vector<32x32xf32>, vector<32x256xf32>, vector<32x256xf32> -> vector<32x256xf32>
    %c0_26 = arith.constant 0 : index
    %c0_27 = arith.constant 0 : index
    %c0_28 = arith.constant 0 : index
    %43 = vector.load %arg10[%c0_26, %c0_27, %c0_28] : memref<2x32x1xf32, #tpu.memory_space<vmem>>, vector<1x32x1xf32>
    %44 = vector.shape_cast %43 : vector<1x32x1xf32> to vector<32x1xf32>
    %45 = vector.broadcast %44 : vector<32x1xf32> to vector<32x256xf32>
    %46 = arith.addf %42, %45 : vector<32x256xf32>
    %cst_29 = arith.constant 0.000000e+00 : f32
    %47 = vector.broadcast %cst_29 : f32 to vector<32x256xf32>
    %48 = arith.maximumf %46, %47 : vector<32x256xf32>
    %c1 = arith.constant 1 : index
    %c0_30 = arith.constant 0 : index
    %c0_31 = arith.constant 0 : index
    %49 = vector.load %arg9[%c1, %c0_30, %c0_31] : memref<2x32x32xf32, #tpu.memory_space<vmem>>, vector<1x32x32xf32>
    %50 = vector.shape_cast %49 : vector<1x32x32xf32> to vector<32x32xf32>
    %cst_32 = arith.constant dense<0.000000e+00> : vector<32x256xf32>
    %51 = tpu.matmul %50, %48, %cst_32 {dimension_numbers = #tpu.dot_dimension_numbers<[1], [0], [0], [1], [0, 0, 1, 1], [], []>} : vector<32x32xf32>, vector<32x256xf32>, vector<32x256xf32> -> vector<32x256xf32>
    %c1_33 = arith.constant 1 : index
    %c0_34 = arith.constant 0 : index
    %c0_35 = arith.constant 0 : index
    %52 = vector.load %arg10[%c1_33, %c0_34, %c0_35] : memref<2x32x1xf32, #tpu.memory_space<vmem>>, vector<1x32x1xf32>
    %53 = vector.shape_cast %52 : vector<1x32x1xf32> to vector<32x1xf32>
    %54 = vector.broadcast %53 : vector<32x1xf32> to vector<32x256xf32>
    %55 = arith.addf %51, %54 : vector<32x256xf32>
    %cst_36 = arith.constant 0.000000e+00 : f32
    %56 = vector.broadcast %cst_36 : f32 to vector<32x256xf32>
    %57 = arith.maximumf %55, %56 : vector<32x256xf32>
    %58 = arith.addf %57, %39 : vector<32x256xf32>
    %c0_37 = arith.constant 0 : index
    %c0_38 = arith.constant 0 : index
    %c0_39 = arith.constant 0 : index
    %59 = vector.load %arg11[%c0_37, %c0_38, %c0_39] : memref<2x32x32xf32, #tpu.memory_space<vmem>>, vector<1x32x32xf32>
    %60 = vector.shape_cast %59 : vector<1x32x32xf32> to vector<32x32xf32>
    %cst_40 = arith.constant dense<0.000000e+00> : vector<32x256xf32>
    %61 = tpu.matmul %60, %58, %cst_40 {dimension_numbers = #tpu.dot_dimension_numbers<[1], [0], [0], [1], [0, 0, 1, 1], [], []>} : vector<32x32xf32>, vector<32x256xf32>, vector<32x256xf32> -> vector<32x256xf32>
    %c0_41 = arith.constant 0 : index
    %c0_42 = arith.constant 0 : index
    %c0_43 = arith.constant 0 : index
    %62 = vector.load %arg12[%c0_41, %c0_42, %c0_43] : memref<2x32x1xf32, #tpu.memory_space<vmem>>, vector<1x32x1xf32>
    %63 = vector.shape_cast %62 : vector<1x32x1xf32> to vector<32x1xf32>
    %64 = vector.broadcast %63 : vector<32x1xf32> to vector<32x256xf32>
    %65 = arith.addf %61, %64 : vector<32x256xf32>
    %cst_44 = arith.constant 0.000000e+00 : f32
    %66 = vector.broadcast %cst_44 : f32 to vector<32x256xf32>
    %67 = arith.maximumf %65, %66 : vector<32x256xf32>
    %c1_45 = arith.constant 1 : index
    %c0_46 = arith.constant 0 : index
    %c0_47 = arith.constant 0 : index
    %68 = vector.load %arg11[%c1_45, %c0_46, %c0_47] : memref<2x32x32xf32, #tpu.memory_space<vmem>>, vector<1x32x32xf32>
    %69 = vector.shape_cast %68 : vector<1x32x32xf32> to vector<32x32xf32>
    %cst_48 = arith.constant dense<0.000000e+00> : vector<32x256xf32>
    %70 = tpu.matmul %69, %67, %cst_48 {dimension_numbers = #tpu.dot_dimension_numbers<[1], [0], [0], [1], [0, 0, 1, 1], [], []>} : vector<32x32xf32>, vector<32x256xf32>, vector<32x256xf32> -> vector<32x256xf32>
    %c1_49 = arith.constant 1 : index
    %c0_50 = arith.constant 0 : index
    %c0_51 = arith.constant 0 : index
    %71 = vector.load %arg12[%c1_49, %c0_50, %c0_51] : memref<2x32x1xf32, #tpu.memory_space<vmem>>, vector<1x32x1xf32>
    %72 = vector.shape_cast %71 : vector<1x32x1xf32> to vector<32x1xf32>
    %73 = vector.broadcast %72 : vector<32x1xf32> to vector<32x256xf32>
    %74 = arith.addf %70, %73 : vector<32x256xf32>
    %cst_52 = arith.constant 0.000000e+00 : f32
    %75 = vector.broadcast %cst_52 : f32 to vector<32x256xf32>
    %76 = arith.maximumf %74, %75 : vector<32x256xf32>
    %c0_53 = arith.constant 0 : index
    %c0_54 = arith.constant 0 : index
    %77 = vector.load %arg13[%c0_53, %c0_54] : memref<4x32xf32, #tpu.memory_space<vmem>>, vector<4x32xf32>
    %cst_55 = arith.constant dense<0.000000e+00> : vector<4x256xf32>
    %78 = tpu.matmul %77, %76, %cst_55 {dimension_numbers = #tpu.dot_dimension_numbers<[1], [0], [0], [1], [0, 0, 1, 1], [], []>} : vector<4x32xf32>, vector<32x256xf32>, vector<4x256xf32> -> vector<4x256xf32>
    %c0_56 = arith.constant 0 : index
    %c0_57 = arith.constant 0 : index
    %79 = vector.load %arg14[%c0_56, %c0_57] : memref<4x1xf32, #tpu.memory_space<vmem>>, vector<4x1xf32>
    %80 = vector.broadcast %79 : vector<4x1xf32> to vector<4x256xf32>
    %81 = arith.addf %78, %80 : vector<4x256xf32>
    %cst_58 = arith.constant 0.000000e+00 : f32
    %82 = vector.broadcast %cst_58 : f32 to vector<4x256xf32>
    %83 = arith.subf %82, %81 : vector<4x256xf32>
    %84 = math.exp %83 : vector<4x256xf32>
    %cst_59 = arith.constant 1.000000e+00 : f32
    %85 = vector.broadcast %cst_59 : f32 to vector<4x256xf32>
    %86 = arith.addf %85, %84 : vector<4x256xf32>
    %cst_60 = arith.constant 1.000000e+00 : f32
    %87 = vector.broadcast %cst_60 : f32 to vector<4x256xf32>
    %88 = arith.divf %87, %86 : vector<4x256xf32>
    %cst_61 = arith.constant 1.000000e+00 : f32
    %89 = vector.broadcast %cst_61 : f32 to vector<4x256xf32>
    %90 = arith.subf %81, %89 : vector<4x256xf32>
    %cst_62 = arith.constant 8.000000e+01 : f32
    %91 = vector.broadcast %cst_62 : f32 to vector<4x256xf32>
    %92 = arith.minimumf %90, %91 : vector<4x256xf32>
    %93 = math.exp %92 : vector<4x256xf32>
    %94 = vector.broadcast %21 : vector<1x256xf32> to vector<4x256xf32>
    %95 = arith.mulf %93, %94 : vector<4x256xf32>
    %96 = tpu.iota {dimensions = array<i32: 0>} : vector<4x256xi32>
    %c3_i32 = arith.constant 3 : i32
    %97 = vector.broadcast %c3_i32 : i32 to vector<4x256xi32>
    %98 = arith.cmpi slt, %96, %97 : vector<4x256xi32>
    %99 = arith.select %98, %88, %95 : vector<4x256xi1>, vector<4x256xf32>
    %c0_63 = arith.constant 0 : index
    %c0_64 = arith.constant 0 : index
    %c0_65 = arith.constant 0 : index
    %100 = vector.load %arg15[%c0_63, %c0_64, %c0_65] : memref<1x4x256xf32, #tpu.memory_space<vmem>>, vector<1x4x256xf32>
    %101 = vector.shape_cast %100 : vector<1x4x256xf32> to vector<4x256xf32>
    %102 = vector.shape_cast %99 : vector<4x256xf32> to vector<1x4x256xf32>
    tpu.vector_store %arg15[%c0_63, %c0_64, %c0_65], %102 {strides = array<i32>} : memref<1x4x256xf32, #tpu.memory_space<vmem>>, vector<1x4x256xf32>,
    return
  }
  func.func @transform_0(%arg0: i32, %arg1: i32) -> (i32, i32, i32) {
    %c0_i32 = arith.constant 0 : i32
    %c0_i32_0 = arith.constant 0 : i32
    return %arg0, %c0_i32, %arg1 : i32, i32, i32
  }
  func.func @transform_1(%arg0: i32, %arg1: i32) -> (i32, i32, i32) {
    %c0_i32 = arith.constant 0 : i32
    %c0_i32_0 = arith.constant 0 : i32
    %c0_i32_1 = arith.constant 0 : i32
    return %arg0, %c0_i32, %c0_i32_0 : i32, i32, i32
  }
  func.func @transform_2(%arg0: i32, %arg1: i32) -> (i32, i32) {
    %c0_i32 = arith.constant 0 : i32
    %c0_i32_0 = arith.constant 0 : i32
    %c0_i32_1 = arith.constant 0 : i32
    return %c0_i32, %c0_i32_0 : i32, i32
  }
  func.func @transform_3(%arg0: i32, %arg1: i32) -> (i32, i32) {
    %c0_i32 = arith.constant 0 : i32
    %c0_i32_0 = arith.constant 0 : i32
    %c0_i32_1 = arith.constant 0 : i32
    return %c0_i32, %c0_i32_0 : i32, i32
  }
  func.func @transform_4(%arg0: i32, %arg1: i32) -> (i32, i32) {
    %c0_i32 = arith.constant 0 : i32
    %c0_i32_0 = arith.constant 0 : i32
    %c0_i32_1 = arith.constant 0 : i32
    return %c0_i32, %c0_i32_0 : i32, i32
  }
  func.func @transform_5(%arg0: i32, %arg1: i32) -> (i32, i32) {
    %c0_i32 = arith.constant 0 : i32
    %c0_i32_0 = arith.constant 0 : i32
    %c0_i32_1 = arith.constant 0 : i32
    return %c0_i32, %c0_i32_0 : i32, i32
  }
  func.func @transform_6(%arg0: i32, %arg1: i32) -> (i32, i32) {
    %c0_i32 = arith.constant 0 : i32
    %c0_i32_0 = arith.constant 0 : i32
    %c0_i32_1 = arith.constant 0 : i32
    return %c0_i32, %c0_i32_0 : i32, i32
  }
  func.func @transform_7(%arg0: i32, %arg1: i32) -> (i32, i32, i32) {
    %c0_i32 = arith.constant 0 : i32
    %c0_i32_0 = arith.constant 0 : i32
    %c0_i32_1 = arith.constant 0 : i32
    %c0_i32_2 = arith.constant 0 : i32
    return %c0_i32, %c0_i32_0, %c0_i32_1 : i32, i32, i32
  }
  func.func @transform_8(%arg0: i32, %arg1: i32) -> (i32, i32, i32) {
    %c0_i32 = arith.constant 0 : i32
    %c0_i32_0 = arith.constant 0 : i32
    %c0_i32_1 = arith.constant 0 : i32
    %c0_i32_2 = arith.constant 0 : i32
    return %c0_i32, %c0_i32_0, %c0_i32_1 : i32, i32, i32
  }
  func.func @transform_9(%arg0: i32, %arg1: i32) -> (i32, i32, i32) {
    %c0_i32 = arith.constant 0 : i32
    %c0_i32_0 = arith.constant 0 : i32
    %c0_i32_1 = arith.constant 0 : i32
    %c0_i32_2 = arith.constant 0 : i32
    return %c0_i32, %c0_i32_0, %c0_i32_1 : i32, i32, i32
  }
  func.func @transform_10(%arg0: i32, %arg1: i32) -> (i32, i32, i32) {
    %c0_i32 = arith.constant 0 : i32
    %c0_i32_0 = arith.constant 0 : i32
    %c0_i32_1 = arith.constant 0 : i32
    %c0_i32_2 = arith.constant 0 : i32
    return %c0_i32, %c0_i32_0, %c0_i32_1 : i32, i32, i32
  }
  func.func @transform_11(%arg0: i32, %arg1: i32) -> (i32, i32) {
    %c0_i32 = arith.constant 0 : i32
    %c0_i32_0 = arith.constant 0 : i32
    %c0_i32_1 = arith.constant 0 : i32
    return %c0_i32, %c0_i32_0 : i32, i32
  }
  func.func @transform_12(%arg0: i32, %arg1: i32) -> (i32, i32) {
    %c0_i32 = arith.constant 0 : i32
    %c0_i32_0 = arith.constant 0 : i32
    %c0_i32_1 = arith.constant 0 : i32
    return %c0_i32, %c0_i32_0 : i32, i32
  }
  func.func @transform_13(%arg0: i32, %arg1: i32) -> (i32, i32, i32) {
    %c0_i32 = arith.constant 0 : i32
    %c0_i32_0 = arith.constant 0 : i32
    return %arg0, %c0_i32, %arg1 : i32, i32, i32
  }
}

</mosaic_0001>

<bundles_post_ra>
// kernel: implicit_decoder_forward.1
= control target key start
LH: loop header
LB: loop body
LE: loop exit
PB: predicated region body
PF: predicated region fallthrough
CT: control target
= control target key end

     0   :  { %s2627_s25 = smov 0   ;;  %s2629_s26 = smov 0   ;;  %s3440_s0 = inlined_call_operand.vmem [shape: f32[2,3,256], index: 0, kind: input, shape index: {}]   ;;  %s3441_s1 = inlined_call_operand.vmem [shape: f32[2,64,1], index: 1, kind: input, shape index: {}]   ;;  %s3442_s2 = inlined_call_operand.vmem [shape: f32[3,1], index: 2, kind: input, shape index: {}]   ;;  %s3443_s3 = inlined_call_operand.vmem [shape: f32[3,1], index: 3, kind: input, shape index: {}]   ;;  %s3444_s4 = inlined_call_operand.vmem [shape: f32[24,3], index: 4, kind: input, shape index: {}]   ;;  %s3445_s5 = inlined_call_operand.vmem [shape: f32[24,1], index: 5, kind: input, shape index: {}]   ;;  %s3446_s6 = inlined_call_operand.vmem [shape: f32[64,24], index: 6, kind: input, shape index: {}]   ;;  %s3447_s7 = inlined_call_operand.vmem [shape: f32[2,32,32], index: 7, kind: input, shape index: {}]   ;;  %s3448_s8 = inlined_call_operand.vmem [shape: f32[2,32,1], index: 8, kind: input, shape index: {}]   ;;  %s3449_s9 = inlined_call_operand.vmem [shape: f32[2,32,32], index: 9, kind: input, shape index: {}]   ;;  %s3450_s10 = inlined_call_operand.vmem [shape: f32[2,32,1], index: 10, kind: input, shape index: {}]   ;;  %s3451_s11 = inlined_call_operand.vmem [shape: f32[4,32], index: 11, kind: input, shape index: {}]   ;;  %s3452_s12 = inlined_call_operand.vmem [shape: f32[4,1], index: 12, kind: input, shape index: {}]   ;;  %s3453_s13 = inlined_call_operand.vmem [shape: f32[2,4,256], index: 13, kind: output, shape index: {}]  }
   0x1   :  { %s2631_s27 = smov 0  }
   0x2 LB: > { %s35_s28 = sadd.s32 1, %s2542_s26  ;;  %p2295_p0 = scmp.ge.s32.totalorder %s2546_s27, 1  ;;  %s2546_s27 = sphi %s2631_s27, %s23_s27   ;;  %s2542_s26 = sphi %s2629_s26, %s3483_s26   ;;  %s2538_s25 = sphi %s2627_s25, %s3482_s25  }
   0x3   : > { %p37_p1 = scmp.ge.s32.totalorder %s35_s28, 2  ;;  %p418_p2 = scmp.lt.s32.totalorder %s2546_s27, 3 }
   0x5   : > { %s3485_s28 = smov (%p37_p1, %s35_s28), 0  ;;  %p419_p3 = pnand %p2295_p0, %p418_p2 }
   0x6   : > { %v501_v0 = vld [vmem:[%s3442_s2] sm:$0x7] (!%p419_p3)  ;;  %v2548_v2 = vmov (!%p419_p3), 0   ;;  %p476_p4 = scmp.lt.s32.totalorder (!%p419_p3), %s2538_s25, 1  ;;  %v3454_v4 = vmov (!%p419_p3), 0.0   ;;  %v549_v5 = vld [vmem:[%s3445_s5 + $0x10] sm:$0xff] (!%p419_p3)  ;;  %v510_v35 = vlaneseq (!%p419_p3) }
   0x7   : > { %422 = sbr.rel (%p419_p3) target bundleno = 1961 (0x7a9), region = 72  ;;  %v502_v1 = vld [vmem:[%s3443_s3] sm:$0x7] (!%p419_p3)  ;;  %2484 = vset.pattern.permute.xlu0 (!%p419_p3), %v2548_v2  ;;  %2485 = vset.pattern.permute.xlu1 (!%p419_p3), %v2548_v2  ;;  %v1504_v8 = vld [vmem:[%s3448_s8 + $0x8] sm:$0xff] (!%p419_p3)  ;;  %v1506_v9 = vld [vmem:[%s3448_s8 + $0x18] sm:$0xff] (!%p419_p3)  ;;  %vm577_vm0 = vcmask (!%p419_p3), 1042432  }
   0x8   : > { %v516_v3 = vsub.f32 (!%p419_p3), %v502_v1, %v501_v0  ;;  %646 = vmatprep.mubr.f32.mxu0 (!%p419_p3), %v3454_v4  ;;  %658 = vmatprep.mubr.f32.mxu1 (!%p419_p3), %v3454_v4  ;;  %v2350_v11 = vld [vmem:[%s3448_s8 + $0x28] sm:$0xff] (!%p419_p3)  ;;  %v2352_v13 = vld [vmem:[%s3448_s8 + $0x38] sm:$0xff] (!%p419_p3)  ;;  %v547_v16 = vld [vmem:[%s3445_s5] sm:$0xff] (!%p419_p3)  ;;  %v2550_v33 = vmov (!%p419_p3), 839922192   ;;  %v2729_v37 = vshrl.u32 (!%p419_p3), %v510_v35, 7 }
   0x9   : > { %v1789_v14 = vld [vmem:[%s3450_s10 + $0x8] sm:$0xff] (!%p419_p3)  ;;  %v1791_v15 = vld [vmem:[%s3450_s10 + $0x18] sm:$0xff] (!%p419_p3)  ;;  %552 = vperm.xlu1 (!%p419_p3), %2485, %v547_v16   ;;  %v1503_v22 = vld [vmem:[%s3448_s8] sm:$0xff] (!%p419_p3)  ;;  %v508_v34 = vunpack.c.l.s4 (!%p419_p3), %v2550_v33  ;;  %vm567_vm4 = vcmask (!%p419_p3), 23552   ;;  %v2553_v33 = vmov (!%p419_p3), 2131351028  }
   0xa   : > { %519 = vperm.xlu0 (!%p419_p3), %2484, %v516_v3   ;;  %v2366_v17 = vld [vmem:[%s3450_s10 + $0x28] sm:$0xff] (!%p419_p3)  ;;  %v2368_v19 = vld [vmem:[%s3450_s10 + $0x38] sm:$0xff] (!%p419_p3)  ;;  %v1505_v23 = vld [vmem:[%s3448_s8 + $0x10] sm:$0xff] (!%p419_p3)  ;;  %v2753_v54 = vsub.s32 (!%p419_p3), 0, %v2729_v37  ;;  %v2168_v55 = vsub.s32 (!%p419_p3), 4, %v2729_v37 }
   0xb   : > { %v548_v18 = vld [vmem:[%s3445_s5 + $0x8] sm:$0xff] (!%p419_p3)  ;;  %v2349_v25 = vld [vmem:[%s3448_s8 + $0x20] sm:$0xff] (!%p419_p3)  ;;  %v2351_v27 = vld [vmem:[%s3448_s8 + $0x30] sm:$0xff] (!%p419_p3)  ;;  %v509_v36 = vunpack.c.0.s8 (!%p419_p3), %v508_v34 }
   0xc   : > { %v1788_v28 = vld [vmem:[%s3450_s10] sm:$0xff] (!%p419_p3)  ;;  %v1790_v29 = vld [vmem:[%s3450_s10 + $0x10] sm:$0xff] (!%p419_p3)  ;;  %v545_v53 = vld [vmem:[%s3444_s4 + $0x8] sm:$0xff] (!%p419_p3) }
   0xd   : > { %557 = vperm.xlu1 (!%p419_p3), %2485, %v548_v18   ;;  %v2365_v30 = vld [vmem:[%s3450_s10 + $0x20] sm:$0xff] (!%p419_p3)  ;;  %v2367_v31 = vld [vmem:[%s3450_s10 + $0x30] sm:$0xff] (!%p419_p3)  ;;  %v512_v38 = vsub.s32 (!%p419_p3), %v509_v36, %v2729_v37  ;;  %v2554_v36 = vmov (!%p419_p3), 2102212464  }
   0xe   : > { %s3487_s25 = smov (!%p476_p4, %s2538_s25), 1  ;;  %505 = vperm.xlu0 %2484, %v501_v0   ;;  %v2061_v32 = vld [vmem:[%s3452_s12] sm:$0xf]  ;;  %v546_v49 = vld [vmem:[%s3444_s4 + $0x10] sm:$0xff] }
   0xf   : > { %s2379_s16 = sshll.u32 %s3487_s25, 6  ;;  %s2378_s23 = sshll.u32 %s3487_s25, 3  ;;  %v544_v48 = vld [vmem:[%s3444_s4] sm:$0xff] }
  0x10   : > { %s2662_s21 = scalar_lea.vmem %s3441_s1, %s2379_s16  ;;  %s483_s30 = scalar_lea.vmem %s3440_s0, %s2378_s23 }
  0x11   : > { %v1298_v6 = vld [vmem:[%s2662_s21 + $0x8] sm:$0xff]  ;;  %v1300_v7 = vld [vmem:[%s2662_s21 + $0x18] sm:$0xff]  ;;  %v1297_v20 = vld [vmem:[%s2662_s21] sm:$0xff]  ;;  %s498_s29 = scalar_lea.vmem %s3453_s13, %s2378_s23 }
  0x12   : > { %562 = vperm.xlu0 %2484, %v549_v5   ;;  %v1302_v10 = vld [vmem:[%s2662_s21 + $0x28] sm:$0xff]  ;;  %v1304_v12 = vld [vmem:[%s2662_s21 + $0x38] sm:$0xff]  ;;  %1307 = vperm.xlu1 %2485, %v1297_v20   ;;  %v1299_v21 = vld [vmem:[%s2662_s21 + $0x10] sm:$0xff] }
  0x13   : > { %v1301_v24 = vld [vmem:[%s2662_s21 + $0x20] sm:$0xff]  ;;  %v1303_v26 = vld [vmem:[%s2662_s21 + $0x30] sm:$0xff] }
  0x14   : > { %v500_v43 = vld [vmem:[%s483_s30] sm:$0x77] }
  0x16   : > { %1312 = vperm.xlu0 %2484, %v1298_v6   ;;  %1317 = vperm.xlu1 %2485, %v1299_v21  }
  0x1a   : > { %1322 = vperm.xlu0 %2484, %v1300_v7   ;;  %1509 = vperm.xlu1 %2485, %v1503_v22  }
  0x1e   : > { %1514 = vperm.xlu0 %2484, %v1504_v8   ;;  %1519 = vperm.xlu1 %2485, %v1505_v23  }
  0x22   : > { %1524 = vperm.xlu0 %2484, %v1506_v9   ;;  %1327 = vperm.xlu1 %2485, %v1301_v24  }
  0x26   : > { %1332 = vperm.xlu0 %2484, %v1302_v10   ;;  %1649 = vperm.xlu1 %2485, %v2349_v25  }
  0x2a   : > { %1654 = vperm.xlu0 %2484, %v2350_v11   ;;  %1337 = vperm.xlu1 %2485, %v1303_v26  }
  0x2e   : > { %1342 = vperm.xlu0 %2484, %v1304_v12   ;;  %1659 = vperm.xlu1 %2485, %v2351_v27   ;;  %v2551_v27 = vmov 683565275  }
  0x32   : > { %1664 = vperm.xlu0 %2484, %v2352_v13   ;;  %1794 = vperm.xlu1 %2485, %v1788_v28  }
  0x36   : > { %1799 = vperm.xlu0 %2484, %v1789_v14   ;;  %1804 = vperm.xlu1 %2485, %v1790_v29   ;;  %v2552_v29 = vmov 2475754826  }
  0x3a   : > { %1809 = vperm.xlu0 %2484, %v1791_v15   ;;  %1933 = vperm.xlu1 %2485, %v2365_v30  }
  0x3e   : > { %1938 = vperm.xlu0 %2484, %v2366_v17   ;;  %1943 = vperm.xlu1 %2485, %v2367_v31  }
  0x42   : > { %1948 = vperm.xlu0 %2484, %v2368_v19   ;;  %2064 = vperm.xlu1 %2485, %v2061_v32  }
  0x88   : > { %v553_v63 = vpop.permute.xlu1 %552 }
  0x89   : > { %v520_v39 = vpop.permute.xlu0 %519 }
  0x8a   : > { %v527_v40 = vrot.slane %v520_v39, %v512_v38 }
  0x8c   : > { %2486 = vrcp.f32 %v527_v40  ;;  %v2555_v40 = vmov 920167782  }
  0x8d   : > { %v506_v41 = vpop.permute.xlu0 %505 }
  0x8e   : > { %v513_v42 = vrot.slane %v506_v41, %v512_v38 }
  0x90   : > { %v515_v44 = vsub.f32 %v500_v43, %v513_v42  ;;  %v3461_v43 = vmov 1326507024  }
  0x91   : > { %v2766_v62 = vpop.permute.xlu0 %562 }
  0x96   : > { %v2487_v45 = vpop.eup %2486 }
  0x97   : > { %v530_v46 = vmul.f32 %v2487_v45, %v515_v44 }
  0x99   : > { %vm531_vm1 = vcmp.gt.f32.partialorder %v530_v46, 0.0  ;;  %vm532_vm2 = vcmp.lt.f32.partialorder %v530_v46, 1.0  ;;  %v566_v47 = vcombine.high %v530_v46, %v530_v46 }
  0x9a   : > { %vm533_vm3 = vmand %vm531_vm1, %vm532_vm2 }
  0x9b   : > { %v534_v50 = vsel %vm533_vm3, 1.0, %v3454_v4  ;;  %2304 = vmatprep.subr.msk.mxu0 %vm577_vm0, %v566_v47  ;;  %2425 = vmatprep.subr.msk.mxu1 %vm577_vm0, %v566_v47 }
  0x9c   : > { %v2302_v51 = vrot.slane %v534_v50, 9  ;;  %2305 = vmatpush1.msk.msra.mxu0 %vm577_vm0, %v530_v46  ;;  %2426 = vmatpush1.msk.msra.mxu1 %vm577_vm0, %v530_v46  ;;  %v2303_v56 = vrot.slane %v534_v50, 10 }
  0x9d   : > { %2306 = vmatmul.mubr.msk.f32.vlgmr.msra.gmra.mrb[0].mxu0 %vm567_vm4, %v544_v48  ;;  %2308 = vmatmul.mubr.msk.f32.vlgmr.msra.gmra.mrb[0].mxu1 %vm567_vm4, %v546_v49 }
  0x9e   : > { %v539_v52 = vmul.f32 %v2302_v51, %v534_v50  ;;  %652 = vmatprep.mubr.f32.mxu0 %v3454_v4  ;;  %1434 = vmatprep.mubr.f32.mxu1 %v3454_v4 }
  0xa0   : > { %v543_v57 = vmul.f32 %v2303_v56, %v539_v52 }
  0xa1   : > { %2307 = vmatmul.mubr.msk.f32.gmra.mrb[2].mxu0 %vm567_vm4, %v545_v53 }
  0xa2   : > { %1604 = vmatprep.mubr.f32.mxu0 %v3454_v4  ;;  %v2165_v58 = vrot.slane %v543_v57, %v2753_v54  ;;  %v2759_v59 = vrot.slane %v543_v57, %v2168_v55 }
  0xa4   : > { %v2762_v60 = vrot.slane %v2165_v58, %v2753_v54 }
 0x170   : > { %v648_v0 = vpop.f32.mrb[0].mxu0  ;;  %v660_v1 = vpop.f32.mrb[0].mxu1 }
 0x171   : > { %v2768_v2 = vadd.f32 %v648_v0, %v553_v63  ;;  %v2771_v3 = vadd.f32 %v660_v1, %v2766_v62  ;;  %v650_v5 = vpop.f32.mrb[1].mxu0  ;;  %v662_v6 = vpop.f32.mrb[1].mxu1 }
 0x172   : > { %v2777_v13 = vadd.f32 %v650_v5, %v553_v63 }
 0x173   : > { %v668_v7 = vand.u32 2139095040, %v2768_v2  ;;  %v1084_v8 = vand.u32 2139095040, %v2771_v3  ;;  %v3460_v18 = vand.u32 2147483647, %v2768_v2  ;;  %v3457_v52 = vand.u32 2147483647, %v2771_v3 }
 0x174   : > { %v2775_v9 = vpop.f32.mrb[2].mxu0  ;;  %v772_v19 = vand.u32 2139095040, %v2777_v13  ;;  %v3459_v5 = vand.u32 2147483647, %v2777_v13 }
 0x175   : > { %v669_v10 = vshrl.u32 %v668_v7, 23  ;;  %v1085_v11 = vshrl.u32 %v1084_v8, 23  ;;  %v2779_v14 = vpop.f32.mrb[3].mxu0  ;;  %v672_v23 = vand.u32 8388607, %v3460_v18  ;;  %v2824_v7 = vadd.f32 %v662_v6, %v2766_v62 }
 0x176   : > { %v773_v25 = vshrl.u32 %v772_v19, 23  ;;  %v1088_v1 = vand.u32 8388607, %v3457_v52 }
 0x177   : > { %v2309_v12 = vadd.s32 4294967169, %v669_v10  ;;  %v2325_v15 = vadd.s32 4294967169, %v1085_v11  ;;  %v673_v49 = vor.u32 8388608, %v672_v23 }
 0x178   : > { %v2313_v48 = vadd.s32 4294967169, %v773_v25 }
 0x179   : > { %v675_v16 = vadd.s32 1, %v2309_v12  ;;  %v1091_v17 = vadd.s32 1, %v2325_v15  ;;  %v2818_v0 = vshll.u32 %v673_v49, 8  ;;  %v776_v49 = vand.u32 8388607, %v3459_v5 }
 0x17a   : > { %v779_v63 = vadd.s32 1, %v2313_v48 }
 0x17b   : > { %vm676_vm5 = vcmp.gt.s32.totalorder %v675_v16, 0  ;;  %vm1092_vm6 = vcmp.gt.s32.totalorder %v1091_v17, 0 }
 0x17c   : > { %v677_v20 = vsel %vm676_vm5, %v675_v16, 0  ;;  %v1093_v22 = vsel %vm1092_vm6, %v1091_v17, 0  ;;  %vm780_vm11 = vcmp.gt.s32.totalorder %v779_v63, 0 }
 0x17d   : > { %v679_v21 = vand.u32 31, %v677_v20  ;;  %v2787_v26 = vshrl.u32 %v677_v20, 5  ;;  %v1095_v31 = vand.u32 31, %v1093_v22  ;;  %v2831_v11 = vshrl.u32 %v1093_v22, 5 }
 0x17f   : > { %v2785_v24 = vsub.s32 32, %v679_v21  ;;  %v682_v28 = vshll.u32 %v2551_v27, %v679_v21  ;;  %v685_v30 = vshll.u32 %v2552_v29, %v679_v21  ;;  %v688_v35 = vshll.u32 %v2553_v33, %v679_v21 }
 0x180   : > { %v691_v39 = vshll.u32 %v2554_v36, %v679_v21  ;;  %v694_v42 = vshll.u32 %v2555_v40, %v679_v21  ;;  %vm697_vm7 = vcmp.lt.s32.totalorder %v2787_v26, 1  ;;  %vm700_vm8 = vcmp.lt.s32.totalorder %v2787_v26, 4 }
 0x181   : > { %v683_v32 = vshrl.u32 %v2552_v29, %v2785_v24  ;;  %v686_v34 = vshrl.u32 %v2553_v33, %v2785_v24  ;;  %v689_v38 = vshrl.u32 %v2554_v36, %v2785_v24  ;;  %v692_v41 = vshrl.u32 %v2555_v40, %v2785_v24 }
 0x182   : > { %v695_v44 = vshrl.u32 %v3461_v43, %v2785_v24  ;;  %vm699_vm9 = vcmp.lt.s32.totalorder %v2787_v26, 3  ;;  %v2812_v56 = vsub.s32 32, %v1095_v31  ;;  %vm698_vm10 = vcmp.lt.s32.totalorder %v2787_v26, 2 }
 0x183   : > { %v684_v45 = vor.u32 %v683_v32, %v682_v28  ;;  %v687_v46 = vor.u32 %v686_v34, %v685_v30  ;;  %v690_v47 = vor.u32 %v689_v38, %v688_v35  ;;  %v693_v50 = vor.u32 %v692_v41, %v691_v39 }
 0x184   : > { %v696_v51 = vor.u32 %v695_v44, %v694_v42  ;;  %v1099_v15 = vshrl.u32 %v2552_v29, %v2812_v56  ;;  %v1102_v62 = vshrl.u32 %v2553_v33, %v2812_v56  ;;  %v1105_v6 = vshrl.u32 %v2554_v36, %v2812_v56 }
 0x185   : > { %v706_v53 = vsel %vm700_vm8, %v693_v50, 920167782  ;;  %v705_v57 = vsel %vm697_vm7, %v684_v45, %v687_v46  ;;  %v709_v8 = vsel %vm697_vm7, %v687_v46, %v690_v47  ;;  %v1107_v16 = vshll.u32 %v2554_v36, %v1095_v31 }
 0x186   : > { %v710_v55 = vsel %vm700_vm8, %v696_v51, 1326507024  ;;  %v707_v58 = vsel %vm699_vm9, %v690_v47, %v706_v53  ;;  %v1108_v17 = vshrl.u32 %v2555_v40, %v2812_v56  ;;  %v1111_v19 = vshrl.u32 %v3461_v43, %v2812_v56 }
 0x187   : > { %v711_v10 = vsel %vm699_vm9, %v693_v50, %v710_v55  ;;  %v708_v12 = vsel %vm698_vm10, %v705_v57, %v707_v58  ;;  %v1098_v21 = vshll.u32 %v2551_v27, %v1095_v31  ;;  %v1101_v22 = vshll.u32 %v2552_v29, %v1095_v31 }
 0x188   : > { %v712_v20 = vsel %vm698_vm10, %v709_v8, %v711_v10  ;;  %v1104_v23 = vshll.u32 %v2553_v33, %v1095_v31  ;;  %v2852_v25 = vmul.u32.u64.low %v2818_v0, %v708_v12  ;;  %v2853_v28 = vmul.u32.u64.high %v2818_v0, %v708_v12, %v2852_v25 }
 0x189   : > { %v1109_v30 = vor.u32 %v1108_v17, %v1107_v16  ;;  %v1110_v32 = vshll.u32 %v2555_v40, %v1095_v31  ;;  %v2857_v34 = vor.u32 %v1099_v15, %v1098_v21  ;;  %v2859_v35 = vor.u32 %v1102_v62, %v1101_v22 }
 0x18a   : > { %v2861_v38 = vor.u32 %v1105_v6, %v1104_v23  ;;  %vm1116_vm12 = vcmp.lt.s32.totalorder %v2831_v11, 4  ;;  %v2865_v39 = vmul.u32.u64.low %v2818_v0, %v712_v20  ;;  %v2866_v41 = vmul.u32.u64.high %v2818_v0, %v712_v20, %v2865_v39 }
 0x18b   : > { %v1112_v42 = vor.u32 %v1111_v19, %v1110_v32  ;;  %v1122_v44 = vsel %vm1116_vm12, %v1109_v30, 920167782  ;;  %v702_v48 = vsel %vm700_vm8, %v690_v47, 2102212464  ;;  %v1089_v31 = vor.u32 8388608, %v1088_v1 }
 0x18c   : > { %v781_v50 = vsel %vm780_vm11, %v779_v63, 0  ;;  %v681_v51 = vshrl.u32 %v2551_v27, %v2785_v24  ;;  %vm1113_vm13 = vcmp.lt.s32.totalorder %v2831_v11, 1  ;;  %vm1115_vm14 = vcmp.lt.s32.totalorder %v2831_v11, 3 }
 0x18d   : > { %v1188_v53 = vand.u32 2139095040, %v2824_v7  ;;  %v1121_v47 = vsel %vm1113_vm13, %v2857_v34, %v2859_v35  ;;  %v1123_v55 = vsel %vm1115_vm14, %v2861_v38, %v1122_v44  ;;  %v703_v24 = vsel %vm699_vm9, %v687_v46, %v702_v48 }
 0x18e   : > { %v701_v57 = vsel %vm697_vm7, %v681_v51, %v684_v45  ;;  %v1126_v58 = vsel %vm1116_vm12, %v1112_v42, 1326507024  ;;  %v783_v63 = vand.u32 31, %v781_v50  ;;  %vm1114_vm15 = vcmp.lt.s32.totalorder %v2831_v11, 2 }
 0x18f   : > { %v2894_v1 = vshll.u32 %v1089_v31, 8  ;;  %v1124_v8 = vsel %vm1114_vm15, %v1121_v47, %v1123_v55  ;;  %v777_v10 = vor.u32 8388608, %v776_v49  ;;  %v1189_v15 = vshrl.u32 %v1188_v53, 23 }
 0x190   : > { %v784_v12 = vsub.s32 32, %v783_v63  ;;  %v704_v45 = vsel %vm698_vm10, %v701_v57, %v703_v24  ;;  %v723_v62 = vadd.s32 1, %v2853_v28  ;;  %v1125_v46 = vsel %vm1113_vm13, %v2859_v35, %v2861_v38 }
 0x191   : > { %v1127_v6 = vsel %vm1115_vm14, %v1109_v30, %v1126_v58  ;;  %vm722_vm0 = vc.u32 %v2866_v41, %v2852_v25  ;;  %v2909_v16 = vshrl.u32 %v781_v50, 5  ;;  %v786_v17 = vshll.u32 %v2551_v27, %v783_v63 }
 0x192   : > { %v787_v26 = vshrl.u32 %v2552_v29, %v784_v12  ;;  %v2914_v19 = vmul.u32.u64.low %v2894_v1, %v1124_v8  ;;  %v2915_v20 = vmul.u32.u64.high %v2894_v1, %v1124_v8, %v2914_v19  ;;  %v789_v21 = vshll.u32 %v2552_v29, %v783_v63 }
 0x193   : > { %v790_v22 = vshrl.u32 %v2553_v33, %v784_v12  ;;  %v1128_v23 = vsel %vm1114_vm15, %v1125_v46, %v1127_v6  ;;  %v792_v32 = vshll.u32 %v2553_v33, %v783_v63  ;;  %v793_v39 = vshrl.u32 %v2554_v36, %v784_v12 }
 0x194   : > { %v788_v30 = vor.u32 %v787_v26, %v786_v17  ;;  %v724_v42 = vsel %vm722_vm0, %v723_v62, %v2853_v28  ;;  %v795_v48 = vshll.u32 %v2554_v36, %v783_v63  ;;  %v796_v31 = vshrl.u32 %v2555_v40, %v784_v12 }
 0x195   : > { %v791_v44 = vor.u32 %v790_v22, %v789_v21  ;;  %v720_v49 = vmul.u32 %v2818_v0, %v704_v45  ;;  %v794_v50 = vor.u32 %v793_v39, %v792_v32  ;;  %v798_v51 = vshll.u32 %v2555_v40, %v783_v63 }
 0x196   : > { %v799_v53 = vshrl.u32 %v3461_v43, %v784_v12  ;;  %v2931_v47 = vmul.u32.u64.low %v2894_v1, %v1128_v23  ;;  %v2932_v55 = vmul.u32.u64.high %v2894_v1, %v1128_v23, %v2931_v47  ;;  %v797_v57 = vor.u32 %v796_v31, %v795_v48 }
 0x197   : > { %vm801_vm1 = vcmp.lt.s32.totalorder %v2909_v16, 1  ;;  %v725_v28 = vadd.s32 %v724_v42, %v720_v49  ;;  %vm804_vm2 = vcmp.lt.s32.totalorder %v2909_v16, 4  ;;  %vm803_vm3 = vcmp.lt.s32.totalorder %v2909_v16, 3 }
 0x198   : > { %v800_v24 = vor.u32 %v799_v53, %v798_v51  ;;  %v809_v58 = vsel %vm801_vm1, %v788_v30, %v791_v44  ;;  %v810_v0 = vsel %vm804_vm2, %v797_v57, 920167782  ;;  %v813_v63 = vsel %vm801_vm1, %v791_v44, %v794_v50 }
 0x199   : > { %v2329_v8 = vadd.s32 4294967169, %v1189_v15  ;;  %vm802_vm4 = vcmp.lt.s32.totalorder %v2909_v16, 2  ;;  %v811_v45 = vsel %vm803_vm3, %v794_v50, %v810_v0  ;;  %v817_v46 = vshll.u32 %v777_v10, 8 }
 0x19a   : > { %v814_v62 = vsel %vm804_vm2, %v800_v24, 1326507024  ;;  %v1097_v6 = vshrl.u32 %v2551_v27, %v2812_v56  ;;  %v1118_v17 = vsel %vm1116_vm12, %v2861_v38, 2102212464  ;;  %v812_v26 = vsel %vm802_vm4, %v809_v58, %v811_v45 }
 0x19b   : > { %v815_v15 = vsel %vm803_vm3, %v797_v57, %v814_v62  ;;  %v726_v21 = vadd.s32 536870912, %v725_v28  ;;  %v2959_v23 = vmul.u32.u64.low %v817_v46, %v812_v26  ;;  %v2960_v32 = vmul.u32.u64.high %v817_v46, %v812_v26, %v2959_v23 }
 0x19c   : > { %v816_v22 = vsel %vm802_vm4, %v813_v63, %v815_v15  ;;  %v806_v56 = vsel %vm804_vm2, %v794_v50, 2102212464  ;;  %v1195_v38 = vadd.s32 1, %v2329_v8  ;;  %v1117_v42 = vsel %vm1113_vm13, %v1097_v6, %v2857_v34 }
 0x19d   : > { %v2965_v10 = vmul.u32.u64.low %v817_v46, %v816_v22  ;;  %v2966_v39 = vmul.u32.u64.high %v817_v46, %v816_v22, %v2965_v10  ;;  %v1119_v48 = vsel %vm1115_vm14, %v2859_v35, %v1118_v17  ;;  %v785_v31 = vshrl.u32 %v2551_v27, %v784_v12 }
 0x19e   : > { %v1139_v49 = vadd.s32 1, %v2915_v20  ;;  %vm1196_vm5 = vcmp.gt.s32.totalorder %v1195_v38, 0  ;;  %vm1138_vm6 = vc.u32 %v2932_v55, %v2914_v19  ;;  %v807_v51 = vsel %vm803_vm3, %v791_v44, %v806_v56 }
 0x19f   : > { %v805_v50 = vsel %vm801_vm1, %v785_v31, %v788_v30  ;;  %v1197_v53 = vsel %vm1196_vm5, %v1195_v38, 0  ;;  %v2982_v34 = vshrl.u32 %v726_v21, 30  ;;  %v1120_v35 = vsel %vm1114_vm15, %v1117_v42, %v1119_v48 }
 0x1a0   : > { %v827_v12 = vadd.s32 1, %v2960_v32  ;;  %vm826_vm7 = vc.u32 %v2966_v39, %v2959_v23  ;;  %v1199_v47 = vand.u32 31, %v1197_v53  ;;  %v1140_v57 = vsel %vm1138_vm6, %v1139_v49, %v2915_v20  ;;  %v558_v49 = vpop.permute.xlu1 %557 }
 0x1a1   : > { %v808_v30 = vsel %vm802_vm4, %v805_v50, %v807_v51  ;;  %v1136_v24 = vmul.u32 %v2894_v1, %v1120_v35  ;;  %v728_v58 = vshll.u32 %v2982_v34, 30  ;;  %v3456_v11 = vand.u32 2147483647, %v2824_v7 }
 0x1a2   : > { %v1200_v44 = vsub.s32 32, %v1199_v47  ;;  %v828_v0 = vsel %vm826_vm7, %v827_v12, %v2960_v32  ;;  %v824_v8 = vmul.u32 %v817_v46, %v808_v30  ;;  %v1202_v26 = vshll.u32 %v2551_v27, %v1199_v47 }
 0x1a3   : > { %v1141_v63 = vadd.s32 %v1140_v57, %v1136_v24  ;;  %v2998_v20 = vsub.s32 %v725_v28, %v728_v58  ;;  %v1192_v16 = vand.u32 8388607, %v3456_v11  ;;  %v1205_v15 = vshll.u32 %v2552_v29, %v1199_v47 }
 0x1a4   : > { %v829_v45 = vadd.s32 %v828_v0, %v824_v8  ;;  %v1203_v62 = vshrl.u32 %v2552_v29, %v1200_v44  ;;  %v1206_v6 = vshrl.u32 %v2553_v33, %v1200_v44  ;;  %v1209_v1 = vshrl.u32 %v2554_v36, %v1200_v44 }
 0x1a5   : > { %v1142_v17 = vadd.s32 536870912, %v1141_v63  ;;  %v1212_v21 = vshrl.u32 %v2555_v40, %v1200_v44  ;;  %v1198_v46 = vshrl.u32 %v1197_v53, 5  ;;  %v1208_v22 = vshll.u32 %v2553_v33, %v1199_v47 }
 0x1a6   : > { %v1211_v32 = vshll.u32 %v2554_v36, %v1199_v47  ;;  %v1215_v28 = vshrl.u32 %v3461_v43, %v1200_v44  ;;  %v830_v56 = vadd.s32 536870912, %v829_v45  ;;  %v1204_v10 = vor.u32 %v1203_v62, %v1202_v26 }
 0x1a7   : > { %v1207_v38 = vor.u32 %v1206_v6, %v1205_v15  ;;  %v1214_v42 = vshll.u32 %v2555_v40, %v1199_v47  ;;  %v1210_v48 = vor.u32 %v1209_v1, %v1208_v22  ;;  %v1193_v50 = vor.u32 8388608, %v1192_v16 }
 0x1a8   : > { %v1213_v31 = vor.u32 %v1212_v21, %v1211_v32  ;;  %v731_v35 = vsub.s32 0, %v2998_v20  ;;  %v3011_v12 = vshrl.u32 %v1142_v17, 30  ;;  %vm1217_vm8 = vcmp.lt.s32.totalorder %v1198_v46, 1 }
 0x1a9   : > { %v1216_v51 = vor.u32 %v1215_v28, %v1214_v42  ;;  %v3014_v53 = vadd.f32 %v2775_v9, %v558_v49  ;;  %v3016_v57 = vshrl.u32 %v830_v56, 30  ;;  %v1201_v30 = vshrl.u32 %v2551_v27, %v1200_v44 }
 0x1aa   : > { %vm1220_vm9 = vcmp.lt.s32.totalorder %v1198_v46, 4  ;;  %v1225_v24 = vsel %vm1217_vm8, %v1204_v10, %v1207_v38  ;;  %vm1219_vm10 = vcmp.lt.s32.totalorder %v1198_v46, 3  ;;  %v1229_v0 = vsel %vm1217_vm8, %v1207_v38, %v1210_v48 }
 0x1ab   : > { %v1222_v47 = vsel %vm1220_vm9, %v1210_v48, 2102212464  ;;  %v1226_v58 = vsel %vm1220_vm9, %v1213_v31, 920167782  ;;  %vm1218_vm11 = vcmp.lt.s32.totalorder %v1198_v46, 2  ;;  %v1233_v6 = vshll.u32 %v1193_v50, 8 }
 0x1ac   : > { %v1227_v8 = vsel %vm1219_vm10, %v1210_v48, %v1226_v58  ;;  %v1230_v62 = vsel %vm1220_vm9, %v1216_v51, 1326507024  ;;  %v1144_v16 = vshll.u32 %v3011_v12, 30  ;;  %v1221_v1 = vsel %vm1217_vm8, %v1201_v30, %v1204_v10 }
 0x1ad   : > { %v1228_v17 = vsel %vm1218_vm11, %v1225_v24, %v1227_v8  ;;  %v1231_v9 = vsel %vm1219_vm10, %v1213_v31, %v1230_v62  ;;  %v1223_v26 = vsel %vm1219_vm10, %v1207_v38, %v1222_v47  ;;  %v832_v44 = vshll.u32 %v3016_v57, 30 }
 0x1ae   : > { %v1232_v15 = vsel %vm1218_vm11, %v1229_v0, %v1231_v9  ;;  %v3020_v21 = vmul.u32.u64.low %v1233_v6, %v1228_v17  ;;  %v3021_v22 = vmul.u32.u64.high %v1233_v6, %v1228_v17, %v3020_v21  ;;  %v876_v46 = vand.u32 2139095040, %v3014_v53 }
 0x1af   : > { %v3025_v32 = vmul.u32.u64.low %v1233_v6, %v1232_v15  ;;  %v3026_v28 = vmul.u32.u64.high %v1233_v6, %v1232_v15, %v3025_v32  ;;  %v1224_v56 = vsel %vm1218_vm11, %v1221_v1, %v1223_v26  ;;  %v2310_v10 = vmin.u32 %v731_v35, %v2998_v20 }
 0x1b0   : > { %v1243_v42 = vadd.s32 1, %v3021_v22  ;;  %v877_v48 = vshrl.u32 %v876_v46, 23  ;;  %v3031_v31 = vsub.s32 %v1141_v63, %v1144_v16  ;;  %v3033_v38 = vsub.s32 %v829_v45, %v832_v44 }
 0x1b1   : > { %v3458_v50 = vand.u32 2147483647, %v3014_v53  ;;  %v1240_v51 = vmul.u32 %v1233_v6, %v1224_v56  ;;  %vm1242_vm12 = vc.u32 %v3026_v28, %v3020_v21  ;;  %v3039_v24 = vadd.f32 %v2779_v14, %v558_v49 }
 0x1b2   : > { %v2317_v30 = vadd.s32 4294967169, %v877_v48  ;;  %v1244_v47 = vsel %vm1242_vm12, %v1243_v42, %v3021_v22  ;;  %v733_v8 = vclz %v2310_v10  ;;  %v1147_v63 = vsub.s32 0, %v3031_v31 }
 0x1b3   : > { %v1245_v58 = vadd.s32 %v1244_v47, %v1240_v51  ;;  %v835_v45 = vsub.s32 0, %v3033_v38  ;;  %v880_v62 = vand.u32 8388607, %v3458_v50  ;;  %v980_v6 = vand.u32 2139095040, %v3039_v24 }
 0x1b4   : > { %v883_v0 = vadd.s32 1, %v2317_v30  ;;  %v2311_v49 = vadd.s32 4294967294, %v733_v8  ;;  %v2326_v17 = vmin.u32 %v1147_v63, %v3031_v31 }
 0x1b5   : > { %v1246_v35 = vadd.s32 536870912, %v1245_v58  ;;  %v2314_v9 = vmin.u32 %v835_v45, %v3033_v38  ;;  %v881_v26 = vor.u32 8388608, %v880_v62  ;;  %v981_v22 = vshrl.u32 %v980_v6, 23 }
 0x1b6   : > { %vm884_vm13 = vcmp.gt.s32.totalorder %v883_v0, 0  ;;  %vm2312_vm14 = vcmp.lt.s32.totalorder %v2311_v49, 0  ;;  %v1149_v61 = vclz %v2326_v17 }
 0x1b7   : > { %v885_v16 = vsel %vm884_vm13, %v883_v0, 0  ;;  %v3047_v1 = vshrl.u32 %v1246_v35, 30  ;;  %v837_v4 = vclz %v2314_v9  ;;  %v921_v11 = vshll.u32 %v881_v26, 8 }
 0x1b8   : > { %v887_v14 = vand.u32 31, %v885_v16  ;;  %v886_v32 = vshrl.u32 %v885_v16, 5  ;;  %v2321_v16 = vadd.s32 4294967169, %v981_v22 }
 0x1b9   : > { %v1248_v44 = vshll.u32 %v3047_v1, 30 }
 0x1ba   : > { %v888_v15 = vsub.s32 32, %v887_v14  ;;  %v890_v46 = vshll.u32 %v2551_v27, %v887_v14  ;;  %v893_v56 = vshll.u32 %v2552_v29, %v887_v14  ;;  %v896_v10 = vshll.u32 %v2553_v33, %v887_v14 }
 0x1bb   : > { %v899_v51 = vshll.u32 %v2554_v36, %v887_v14  ;;  %v902_v0 = vshll.u32 %v2555_v40, %v887_v14  ;;  %vm905_vm15 = vcmp.lt.s32.totalorder %v886_v32, 1  ;;  %v3062_v52 = vsub.s32 %v1245_v58, %v1248_v44 }
 0x1bc   : > { %v891_v42 = vshrl.u32 %v2552_v29, %v888_v15  ;;  %v894_v48 = vshrl.u32 %v2553_v33, %v888_v15  ;;  %v897_v30 = vshrl.u32 %v2554_v36, %v888_v15  ;;  %v900_v47 = vshrl.u32 %v2555_v40, %v888_v15 }
 0x1bd   : > { %v903_v8 = vshrl.u32 %v3461_v43, %v888_v15  ;;  %v889_v50 = vshrl.u32 %v2551_v27, %v888_v15  ;;  %vm908_vm0 = vcmp.lt.s32.totalorder %v886_v32, 4  ;;  %vm907_vm1 = vcmp.lt.s32.totalorder %v886_v32, 3 }
 0x1be   : > { %v892_v63 = vor.u32 %v891_v42, %v890_v46  ;;  %v895_v45 = vor.u32 %v894_v48, %v893_v56  ;;  %v898_v35 = vor.u32 %v897_v30, %v896_v10  ;;  %v901_v62 = vor.u32 %v900_v47, %v899_v51 }
 0x1bf   : > { %v904_v6 = vor.u32 %v903_v8, %v902_v0  ;;  %vm906_vm2 = vcmp.lt.s32.totalorder %v886_v32, 2  ;;  %v987_v42 = vadd.s32 1, %v2321_v16  ;;  %v2315_v10 = vadd.s32 4294967294, %v837_v4 }
 0x1c0   : > { %v913_v5 = vsel %vm905_vm15, %v892_v63, %v895_v45  ;;  %v910_v14 = vsel %vm908_vm0, %v898_v35, 2102212464  ;;  %v914_v18 = vsel %vm908_vm0, %v901_v62, 920167782  ;;  %v917_v43 = vsel %vm905_vm15, %v895_v45, %v898_v35 }
 0x1c1   : > { %v915_v46 = vsel %vm907_vm1, %v898_v35, %v914_v18  ;;  %v918_v56 = vsel %vm908_vm0, %v904_v6, 1326507024  ;;  %v909_v48 = vsel %vm905_vm15, %v889_v50, %v892_v63  ;;  %v911_v22 = vsel %vm907_vm1, %v895_v45, %v910_v14 }
 0x1c2   : > { %v916_v17 = vsel %vm906_vm2, %v913_v5, %v915_v46  ;;  %v919_v9 = vsel %vm907_vm1, %v901_v62, %v918_v56  ;;  %v1251_v15 = vsub.s32 0, %v3062_v52  ;;  %vm988_vm3 = vcmp.gt.s32.totalorder %v987_v42, 0 }
 0x1c3   : > { %v920_v26 = vsel %vm906_vm2, %v917_v43, %v919_v9  ;;  %v3065_v58 = vmul.u32.u64.low %v921_v11, %v916_v17  ;;  %v3066_v44 = vmul.u32.u64.high %v921_v11, %v916_v17, %v3065_v58  ;;  %v912_v32 = vsel %vm906_vm2, %v909_v48, %v911_v22 }
 0x1c4   : > { %v3070_v51 = vmul.u32.u64.low %v921_v11, %v920_v26  ;;  %v3071_v30 = vmul.u32.u64.high %v921_v11, %v920_v26, %v3070_v51  ;;  %v989_v18 = vsel %vm988_vm3, %v987_v42, 0  ;;  %v3074_v47 = vsel %vm2312_vm14, 0, %v2311_v49 }
 0x1c5   : > { %v2327_v50 = vadd.s32 4294967294, %v1149_v61  ;;  %v977_v5 = vand.u32 2147483647, %v3039_v24  ;;  %vm2316_vm4 = vcmp.lt.s32.totalorder %v2315_v10, 0  ;;  %v931_v4 = vadd.s32 1, %v3066_v44 }
 0x1c6   : > { %v991_v43 = vand.u32 31, %v989_v18  ;;  %v2330_v0 = vmin.u32 %v1251_v15, %v3062_v52  ;;  %v928_v8 = vmul.u32 %v921_v11, %v912_v32  ;;  %vm930_vm5 = vc.u32 %v3071_v30, %v3065_v58 }
 0x1c7   : > { %v741_v63 = vsub.s32 4294967266, %v3074_v47  ;;  %v932_v45 = vsel %vm930_vm5, %v931_v4, %v3066_v44  ;;  %vm2328_vm6 = vcmp.lt.s32.totalorder %v2327_v50, 0  ;;  %v3083_v49 = vsel %vm2316_vm4, 0, %v2315_v10 }
 0x1c8   : > { %v992_v35 = vsub.s32 32, %v991_v43  ;;  %v933_v61 = vadd.s32 %v932_v45, %v928_v8  ;;  %v984_v62 = vand.u32 8388607, %v977_v5  ;;  %v994_v6 = vshll.u32 %v2551_v27, %v991_v43 }
 0x1c9   : > { %v1253_v46 = vclz %v2330_v0  ;;  %v990_v42 = vshrl.u32 %v989_v18, 5  ;;  %v997_v48 = vshll.u32 %v2552_v29, %v991_v43  ;;  %v1000_v17 = vshll.u32 %v2553_v33, %v991_v43 }
 0x1ca   : > { %v995_v16 = vshrl.u32 %v2552_v29, %v992_v35  ;;  %v998_v11 = vshrl.u32 %v2553_v33, %v992_v35  ;;  %v1001_v14 = vshrl.u32 %v2554_v36, %v992_v35  ;;  %v934_v56 = vadd.s32 536870912, %v933_v61 }
 0x1cb   : > { %v1003_v9 = vshll.u32 %v2554_v36, %v991_v43  ;;  %v1004_v10 = vshrl.u32 %v2555_v40, %v992_v35  ;;  %v1006_v15 = vshll.u32 %v2555_v40, %v991_v43  ;;  %v3462_v51 = vmov 1326507024  }
 0x1cc   : > { %v996_v22 = vor.u32 %v995_v16, %v994_v6  ;;  %v3095_v26 = vshrl.u32 %v934_v56, 30  ;;  %v999_v44 = vor.u32 %v998_v11, %v997_v48  ;;  %v1007_v32 = vshrl.u32 %v3462_v51, %v992_v35 }
 0x1cd   : > { %v737_v4 = vsub.s32 32, %v3074_v47  ;;  %v1002_v0 = vor.u32 %v1001_v14, %v1000_v17  ;;  %v1005_v18 = vor.u32 %v1004_v10, %v1003_v9  ;;  %v2331_v8 = vadd.s32 4294967294, %v1253_v46 }
 0x1ce   : > { %v936_v29 = vshll.u32 %v3095_v26, 30  ;;  %v985_v45 = vor.u32 8388608, %v984_v62  ;;  %v1008_v33 = vor.u32 %v1007_v32, %v1006_v15  ;;  %v742_v6 = vadd.s32 127, %v741_v63 }
 0x1cf   : > { %v3102_v36 = vsel %vm2328_vm6, 0, %v2327_v50  ;;  %v845_v16 = vsub.s32 4294967266, %v3083_v49  ;;  %vm1009_vm7 = vcmp.lt.s32.totalorder %v990_v42, 1  ;;  %v993_v40 = vshrl.u32 %v2551_v27, %v992_v35 }
 0x1d0   : > { %v3105_v11 = vsub.s32 %v933_v61, %v936_v29  ;;  %vm1012_vm8 = vcmp.lt.s32.totalorder %v990_v42, 4  ;;  %v1017_v43 = vsel %vm1009_vm7, %v996_v22, %v999_v44  ;;  %v1021_v46 = vsel %vm1009_vm7, %v999_v44, %v1002_v0 }
 0x1d1   : > { %v1014_v14 = vsel %vm1012_vm8, %v1002_v0, 2102212464  ;;  %v1018_v56 = vsel %vm1012_vm8, %v1005_v18, 920167782  ;;  %v1022_v48 = vsel %vm1012_vm8, %v1008_v33, 1326507024  ;;  %v1013_v50 = vsel %vm1009_vm7, %v993_v40, %v996_v22 }
 0x1d2   : > { %vm2332_vm9 = vcmp.lt.s32.totalorder %v2331_v8, 0  ;;  %v939_v62 = vsub.s32 0, %v3105_v11  ;;  %vm1011_vm10 = vcmp.lt.s32.totalorder %v990_v42, 3  ;;  %v1025_v63 = vshll.u32 %v985_v45, 8 }
 0x1d3   : > { %vm1010_vm11 = vcmp.lt.s32.totalorder %v990_v42, 2  ;;  %v1019_v17 = vsel %vm1011_vm10, %v1002_v0, %v1018_v56  ;;  %v1023_v9 = vsel %vm1011_vm10, %v1005_v18, %v1022_v48  ;;  %v1015_v10 = vsel %vm1011_vm10, %v999_v44, %v1014_v14 }
 0x1d4   : > { %v2318_v61 = vmin.u32 %v939_v62, %v3105_v11  ;;  %v1020_v27 = vsel %vm1010_vm11, %v1017_v43, %v1019_v17  ;;  %v1024_v35 = vsel %vm1010_vm11, %v1021_v46, %v1023_v9  ;;  %v721_v45 = vadd.s32 %v2852_v25, %v2866_v41 }
 0x1d5   : > { %v3112_v15 = vmul.u32.u64.low %v1025_v63, %v1024_v35  ;;  %v3113_v51 = vmul.u32.u64.high %v1025_v63, %v1024_v35, %v3112_v15  ;;  %v3115_v32 = vmul.u32.u64.low %v1025_v63, %v1020_v27  ;;  %v3116_v29 = vmul.u32.u64.high %v1025_v63, %v1020_v27, %v3115_v32 }
 0x1d6   : > { %v846_v22 = vadd.s32 127, %v845_v16  ;;  %v941_v0 = vclz %v2318_v61  ;;  %v743_v18 = vshll.u32 %v742_v6, 23  ;;  %v1157_v33 = vsub.s32 4294967266, %v3102_v36 }
 0x1d7   : > { %v3123_v44 = vsel %vm2332_vm9, 0, %v2331_v8  ;;  %v1016_v40 = vsel %vm1010_vm11, %v1013_v50, %v1015_v10  ;;  %v738_v43 = vshll.u32 %v2998_v20, %v3074_v47  ;;  %v841_v14 = vsub.s32 32, %v3083_v49 }
 0x1d8   : > { %v2319_v56 = vadd.s32 4294967294, %v941_v0  ;;  %v739_v46 = vshrl.u32 %v721_v45, %v737_v4  ;;  %v825_v25 = vadd.s32 %v2959_v23, %v2966_v39  ;;  %vm1034_vm12 = vc.u32 %v3113_v51, %v3115_v32 }
 0x1d9   : > { %v1035_v41 = vadd.s32 1, %v3116_v29  ;;  %v847_v6 = vshll.u32 %v846_v22, 23  ;;  %v1261_v8 = vsub.s32 4294967266, %v3123_v44  ;;  %v1032_v42 = vmul.u32 %v1025_v63, %v1016_v40 }
 0x1da   : > { %vm2320_vm13 = vcmp.lt.s32.totalorder %v2319_v56, 0  ;;  %v744_v16 = vor.u32 4788187, %v743_v18  ;;  %v1158_v48 = vadd.s32 127, %v1157_v33  ;;  %v843_v62 = vshrl.u32 %v825_v25, %v841_v14 }
 0x1db   : > { %v944_v20 = vsel %vm2320_vm13, 0, %v2319_v56  ;;  %v1036_v47 = vsel %vm1034_vm12, %v1035_v41, %v3116_v29  ;;  %v740_v23 = vor.u32 %v739_v46, %v738_v43  ;;  %v1153_v39 = vsub.s32 32, %v3102_v36 }
 0x1dc   : > { %v945_v4 = vsub.s32 32, %v944_v20  ;;  %v949_v50 = vsub.s32 4294967266, %v944_v20  ;;  %v1037_v17 = vadd.s32 %v1036_v47, %v1032_v42  ;;  %v842_v9 = vshll.u32 %v3033_v38, %v3083_v49 }
 0x1dd   : > { %v929_v61 = vadd.s32 %v3065_v58, %v3071_v30  ;;  %v848_v10 = vor.u32 4788187, %v847_v6  ;;  %v1262_v63 = vadd.s32 127, %v1261_v8  ;;  %v745_v15 = vand.u32 2147483647, %v744_v16 }
 0x1de   : > { %v950_v27 = vadd.s32 127, %v949_v50  ;;  %v1038_v35 = vadd.s32 536870912, %v1037_v17  ;;  %v1137_v29 = vadd.s32 %v2914_v19, %v2932_v55  ;;  %v1159_v45 = vshll.u32 %v1158_v48, 23 }
 0x1df   : > { %v947_v22 = vshrl.u32 %v929_v61, %v945_v4  ;;  %v844_v0 = vor.u32 %v843_v62, %v842_v9  ;;  %v1257_v18 = vsub.s32 32, %v3123_v44  ;;  %v747_v38 = vcvt.s32.f32 %v740_v23 }
 0x1e0   : > { %v951_v33 = vshll.u32 %v950_v27, 23  ;;  %v3144_v40 = vshrl.u32 %v1038_v35, 30  ;;  %v1155_v49 = vshrl.u32 %v1137_v29, %v1153_v39  ;;  %v1241_v58 = vadd.s32 %v3020_v21, %v3026_v28 }
 0x1e1   : > { %v946_v30 = vshll.u32 %v3105_v11, %v944_v20  ;;  %v849_v43 = vand.u32 2147483647, %v848_v10  ;;  %v1263_v14 = vshll.u32 %v1262_v63, 23  ;;  %v748_v55 = vmul.f32 %v747_v38, %v745_v15 }
 0x1e2   : > { %v952_v56 = vor.u32 4788187, %v951_v33  ;;  %v1040_v19 = vshll.u32 %v3144_v40, 30  ;;  %v1154_v46 = vshll.u32 %v3031_v31, %v3102_v36  ;;  %v1160_v25 = vor.u32 4788187, %v1159_v45 }
 0x1e3   : > { %v948_v41 = vor.u32 %v947_v22, %v946_v30  ;;  %v851_v6 = vcvt.s32.f32 %v844_v0  ;;  %v1259_v8 = vshrl.u32 %v1241_v58, %v1257_v18  ;;  %v1258_v21 = vshll.u32 %v3062_v52, %v3123_v44 }
 0x1e4   : > { %v1041_v42 = vsub.s32 %v1037_v17, %v1040_v19  ;;  %v1156_v16 = vor.u32 %v1155_v49, %v1154_v46  ;;  %v953_v48 = vand.u32 2147483647, %v952_v56  ;;  %v1264_v28 = vor.u32 4788187, %v1263_v14 }
 0x1e5   : > { %v852_v47 = vmul.f32 %v851_v6, %v849_v43  ;;  %v749_v20 = vxor.u32 2147483648, %v748_v55  ;;  %v1161_v62 = vand.u32 2147483647, %v1160_v25  ;;  %v955_v4 = vcvt.s32.f32 %v948_v41 }
 0x1e6   : > { %v1043_v11 = vsub.s32 0, %v1041_v42  ;;  %v1260_v50 = vor.u32 %v1259_v8, %v1258_v21  ;;  %v1163_v39 = vcvt.s32.f32 %v1156_v16  ;;  %vm667_vm14 = vcmp.lt.s32.totalorder %v2768_v2, 0 }
 0x1e7   : > { %v956_v31 = vmul.f32 %v955_v4, %v953_v48  ;;  %v853_v36 = vxor.u32 2147483648, %v852_v47  ;;  %v1265_v9 = vand.u32 2147483647, %v1264_v28  ;;  %v750_v61 = vsel %vm667_vm14, %v749_v20, %v748_v55 }
 0x1e8   : > { %v2322_v23 = vmin.u32 %v1043_v11, %v1041_v42  ;;  %v1164_v10 = vmul.f32 %v1163_v39, %v1161_v62  ;;  %v1267_v63 = vcvt.s32.f32 %v1260_v50  ;;  %v3463_v44 = vand.u32 2147483647, %v2768_v2 }
 0x1e9   : > { %vm1083_vm0 = vcmp.lt.s32.totalorder %v2771_v3, 0  ;;  %vm771_vm1 = vcmp.lt.s32.totalorder %v2777_v13, 0  ;;  %v957_v35 = vxor.u32 2147483648, %v956_v31  ;;  %v751_v22 = vsub.s32 4, %v2982_v34 }
 0x1ea   : > { %v1045_v17 = vclz %v2322_v23  ;;  %vm3159_vm15 = vcmp.le.f32.partialorder %v3463_v44, 0.7853982  ;;  %v854_v29 = vsel %vm771_vm1, %v853_v36, %v852_v47  ;;  %v1268_v45 = vmul.f32 %v1267_v63, %v1265_v9 }
 0x1eb   : > { %v753_v15 = vsel %vm3159_vm15, %v2768_v2, %v750_v61  ;;  %v1165_v0 = vxor.u32 2147483648, %v1164_v10  ;;  %v3466_v18 = vand.u32 2147483647, %v2777_v13  ;;  %vm875_vm4 = vcmp.lt.s32.totalorder %v3014_v53, 0 }
 0x1ec   : > { %v2323_v52 = vadd.s32 4294967294, %v1045_v17  ;;  %v1033_v49 = vadd.s32 %v3115_v32, %v3113_v51  ;;  %2488 = vcosq.f32 %v753_v15  ;;  %v958_v14 = vsel %vm875_vm4, %v957_v35, %v956_v31 }
 0x1ed   : > { %vm3173_vm3 = vcmp.le.f32.partialorder %v3466_v18, 0.7853982  ;;  %v855_v56 = vsub.s32 4, %v3016_v57  ;;  %v1269_v19 = vxor.u32 2147483648, %v1268_v45  ;;  %2490 = vsinq.f32 %v753_v15 }
 0x1ee   : > { %vm2324_vm2 = vcmp.lt.s32.totalorder %v2323_v52, 0  ;;  %v857_v43 = vsel %vm3173_vm3, %v2777_v13, %v854_v29  ;;  %v1166_v51 = vsel %vm1083_vm0, %v1165_v0, %v1164_v10  ;;  %v3469_v32 = vand.u32 2147483647, %v3014_v53 }
 0x1ef   : > { %v1048_v38 = vsel %vm2324_vm2, 0, %v2323_v52  ;;  %2492 = vcosq.f32 %v857_v43  ;;  %v3472_v48 = vand.u32 2147483647, %v2771_v3  ;;  %vm1187_vm7 = vcmp.lt.s32.totalorder %v2824_v7, 0 }
 0x1f0   : > { %v1049_v58 = vsub.s32 32, %v1048_v38  ;;  %v1053_v30 = vsub.s32 4294967266, %v1048_v38  ;;  %v1050_v55 = vshll.u32 %v1041_v42, %v1048_v38  ;;  %vm3190_vm5 = vcmp.le.f32.partialorder %v3469_v32, 0.7853982 }
 0x1f1   : > { %v961_v6 = vsel %vm3190_vm5, %v3014_v53, %v958_v14  ;;  %v752_v42 = vsel %vm667_vm14, %v751_v22, %v2982_v34  ;;  %vm3202_vm6 = vcmp.le.f32.partialorder %v3472_v48, 0.7853982  ;;  %2494 = vsinq.f32 %v857_v43 }
 0x1f2   : > { %v1051_v46 = vshrl.u32 %v1033_v49, %v1049_v58  ;;  %v1054_v25 = vadd.s32 127, %v1053_v30  ;;  %v1270_v21 = vsel %vm1187_vm7, %v1269_v19, %v1268_v45  ;;  %v959_v28 = vsub.s32 4, %v3095_v26 }
 0x1f3   : > { %v856_v20 = vsel %vm771_vm1, %v855_v56, %v3016_v57  ;;  %v1169_v34 = vsel %vm3202_vm6, %v2771_v3, %v1166_v51  ;;  %2496 = vcosq.f32 %v961_v6  ;;  %v3475_v50 = vand.u32 2147483647, %v2824_v7 }
 0x1f4   : > { %v1052_v8 = vor.u32 %v1051_v46, %v1050_v55  ;;  %v1055_v16 = vshll.u32 %v1054_v25, 23  ;;  %2498 = vsinq.f32 %v961_v6  ;;  %v754_v39 = vsel %vm3159_vm15, 0, %v752_v42 }
 0x1f5   : > { %vm3218_vm8 = vcmp.le.f32.partialorder %v3475_v50, 0.7853982  ;;  %v858_v57 = vsel %vm3173_vm3, 0, %v856_v20  ;;  %v1271_v31 = vsub.s32 4, %v3047_v1  ;;  %v960_v9 = vsel %vm875_vm4, %v959_v28, %v3095_v26 }
 0x1f6   : > { %v1056_v11 = vor.u32 4788187, %v1055_v16  ;;  %v1059_v4 = vcvt.s32.f32 %v1052_v8  ;;  %v1273_v36 = vsel %vm3218_vm8, %v2824_v7, %v1270_v21  ;;  %v1063_v61 = vsub.s32 4, %v3144_v40  ;;  %v2489_v10 = vpop.eup %2488 }
 0x1f7   : > { %2500 = vcosq.f32 %v1169_v34  ;;  %v758_v63 = vadd.s32 3, %v754_v39  ;;  %v862_v44 = vadd.s32 3, %v858_v57  ;;  %v2491_v27 = vpop.eup %2490  ;;  %v962_v35 = vsel %vm3190_vm5, 0, %v960_v9 }
 0x1f8   : > { %v1057_v62 = vand.u32 2147483647, %v1056_v11  ;;  %2502 = vcosq.f32 %v1273_v36  ;;  %vm979_vm9 = vcmp.lt.s32.totalorder %v3039_v24, 0  ;;  %v1272_v15 = vsel %vm1187_vm7, %v1271_v31, %v3047_v1 }
 0x1f9   : > { %2504 = vsinq.f32 %v1273_v36  ;;  %v2493_v26 = vpop.eup %2492  ;;  %vm3242_vm10 = vcmp.le.f32.partialorder %v977_v5, 0.7853982  ;;  %v1064_v22 = vsel %vm979_vm9, %v1063_v61, %v3144_v40  ;;  %v1167_v0 = vsub.s32 4, %v3011_v12 }
 0x1fa   : > { %v1060_v17 = vmul.f32 %v1059_v4, %v1057_v62  ;;  %2506 = vsinq.f32 %v1169_v34  ;;  %v966_v1 = vadd.s32 3, %v962_v35  ;;  %v863_v38 = vand.u32 3, %v862_v44 }
 0x1fb   : > { %v2495_v18 = vpop.eup %2494  ;;  %v1274_v5 = vsel %vm3218_vm8, 0, %v1272_v15  ;;  %v1066_v58 = vsel %vm3242_vm10, 0, %v1064_v22  ;;  %v869_v43 = vxor.u32 2147483648, %v2493_v26  ;;  %v759_v14 = vand.u32 3, %v758_v63 }
 0x1fc   : > { %v1061_v52 = vxor.u32 2147483648, %v1060_v17  ;;  %v866_v30 = vxor.u32 2147483648, %v2495_v18  ;;  %v1168_v56 = vsel %vm1083_vm0, %v1167_v0, %v3011_v12  ;;  %v762_v19 = vxor.u32 2147483648, %v2491_v27 }
 0x1fd   : > { %v2497_v49 = vpop.eup %2496  ;;  %v765_v55 = vxor.u32 2147483648, %v2489_v10  ;;  %v1278_v46 = vadd.s32 3, %v1274_v5  ;;  %vm865_vm11 = vcmp.eq.s32.totalorder %v863_v38, 0  ;;  %v1070_v25 = vadd.s32 3, %v1066_v58  ;;  %v1292_v58 = vld [vmem:[%s3446_s6 + $0x18] sm:$0xff] }
 0x1fe   : > { %v1062_v45 = vsel %vm979_vm9, %v1061_v52, %v1060_v17  ;;  %v2499_v40 = vpop.eup %2498  ;;  %v967_v51 = vand.u32 3, %v966_v1  ;;  %vm868_vm12 = vcmp.eq.s32.totalorder %v863_v38, 2  ;;  %v973_v6 = vxor.u32 2147483648, %v2497_v49 }
 0x1ff   : > { %v1065_v33 = vsel %vm3242_vm10, %v3039_v24, %v1062_v45  ;;  %v970_v41 = vxor.u32 2147483648, %v2499_v40  ;;  %v1170_v8 = vsel %vm3202_vm6, 0, %v1168_v56  ;;  %vm861_vm13 = vweird.f32 %v2777_v13 }
 0x200   : > { %2508 = vcosq.f32 %v1065_v33  ;;  %v867_v42 = vsel %vm865_vm11, %v2493_v26, %v866_v30  ;;  %v870_v48 = vsel %vm868_vm12, %v869_v43, %v2495_v18  ;;  %vm757_vm14 = vweird.f32 %v2768_v2  ;;  %v1294_v30 = vld [vmem:[%s3446_s6 + $0x28] sm:$0xff]  ;;  %v1295_v43 = vld [vmem:[%s3446_s6 + $0x30] sm:$0xff] }
 0x201   : > { %2510 = vsinq.f32 %v1065_v33  ;;  %v2501_v32 = vpop.eup %2500  ;;  %vm761_vm15 = vcmp.eq.s32.totalorder %v759_v14, 0  ;;  %vm764_vm0 = vcmp.eq.s32.totalorder %v759_v14, 2  ;;  %vm864_vm1 = vcmp.lt.s32.totalorder %v863_v38, 2 }
 0x202   : > { %v2503_v16 = vpop.eup %2502  ;;  %vm1069_vm2 = vweird.f32 %v3039_v24  ;;  %v763_v21 = vsel %vm761_vm15, %v2489_v10, %v762_v19  ;;  %v766_v28 = vsel %vm764_vm0, %v765_v55, %v2491_v27  ;;  %v1279_v11 = vand.u32 3, %v1278_v46  ;;  %v1308_v55 = vpop.permute.xlu1 %1307 }
 0x203   : > { %v2505_v12 = vpop.eup %2504  ;;  %v1071_v20 = vand.u32 3, %v1070_v25  ;;  %vm969_vm3 = vcmp.eq.s32.totalorder %v967_v51, 0  ;;  %vm972_vm4 = vcmp.eq.s32.totalorder %v967_v51, 2  ;;  %v1174_v47 = vadd.s32 3, %v1170_v8  ;;  %v1313_v25 = vpop.permute.xlu0 %1312 }
 0x204   : > { %v2507_v34 = vpop.eup %2506  ;;  %v871_v62 = vsel %vm864_vm1, %v867_v42, %v870_v48  ;;  %vm760_vm5 = vcmp.lt.s32.totalorder %v759_v14, 2  ;;  %v971_v4 = vsel %vm969_vm3, %v2497_v49, %v970_v41  ;;  %v974_v50 = vsel %vm972_vm4, %v973_v6, %v2499_v40  ;;  %v1293_v40 = vld [vmem:[%s3446_s6 + $0x20] sm:$0xff]  ;;  %v1296_v14 = vld [vmem:[%s3446_s6 + $0x38] sm:$0xff] }
 0x205   : > { %v767_v39 = vsel %vm760_vm5, %v763_v21, %v766_v28  ;;  %vm965_vm6 = vweird.f32 %v3014_v53  ;;  %v1282_v57 = vxor.u32 2147483648, %v2505_v12  ;;  %v1285_v31 = vxor.u32 2147483648, %v2503_v16  ;;  %v1289_v53 = vld [vmem:[%s3446_s6] sm:$0xff] }
 0x206   : > { %vm968_vm7 = vcmp.lt.s32.totalorder %v967_v51, 2  ;;  %vm1281_vm8 = vcmp.eq.s32.totalorder %v1279_v11, 0  ;;  %vm1284_vm9 = vcmp.eq.s32.totalorder %v1279_v11, 2  ;;  %vm1076_vm10 = vcmp.eq.s32.totalorder %v1071_v20, 2 }
 0x207   : > { %v975_v61 = vsel %vm968_vm7, %v971_v4, %v974_v50  ;;  %v1175_v10 = vand.u32 3, %v1174_v47  ;;  %vm1073_vm11 = vcmp.eq.s32.totalorder %v1071_v20, 0  ;;  %v1178_v52 = vxor.u32 2147483648, %v2507_v34 }
 0x208   : > { %v1181_v44 = vxor.u32 2147483648, %v2501_v32  ;;  %vm1072_vm12 = vcmp.lt.s32.totalorder %v1071_v20, 2  ;;  %v1283_v35 = vsel %vm1281_vm8, %v2503_v16, %v1282_v57  ;;  %v1286_v15 = vsel %vm1284_vm9, %v1285_v31, %v2505_v12  ;;  %v1318_v20 = vpop.permute.xlu1 %1317 }
 0x209   : > { %v872_v26 = vsel %vm861_vm13, nan, %v871_v62  ;;  %v768_v45 = vsel %vm757_vm14, nan, %v767_v39  ;;  %v976_v22 = vsel %vm965_vm6, nan, %v975_v61  ;;  %vm1280_vm15 = vcmp.lt.s32.totalorder %v1279_v11, 2  ;;  %v1323_v62 = vpop.permute.xlu0 %1322 }
 0x20a   : > { %v2509_v23 = vpop.eup %2508  ;;  %vm1177_vm0 = vcmp.eq.s32.totalorder %v1175_v10, 0  ;;  %vm1180_vm1 = vcmp.eq.s32.totalorder %v1175_v10, 2  ;;  %v1287_v33 = vsel %vm1280_vm15, %v1283_v35, %v1286_v15  ;;  %v2383_v5 = vpack.c.bf16 %v976_v22, %v768_v45  ;;  %v1499_v35 = vld [vmem:[%s3447_s7] sm:$0xff] }
 0x20b   : > { %v2511_v36 = vpop.eup %2510  ;;  %v1077_v9 = vxor.u32 2147483648, %v2509_v23  ;;  %v1179_v1 = vsel %vm1177_vm0, %v2501_v32, %v1178_v52  ;;  %v1182_v38 = vsel %vm1180_vm1, %v1181_v44, %v2507_v34  ;;  %vm1277_vm13 = vweird.f32 %v2824_v7  ;;  %v1290_v7 = vld [vmem:[%s3446_s6 + $0x8] sm:$0xff] }
 0x20c   : > { %v1074_v17 = vxor.u32 2147483648, %v2511_v36  ;;  %vm1176_vm3 = vcmp.lt.s32.totalorder %v1175_v10, 2  ;;  %v1288_v2 = vsel %vm1277_vm13, nan, %v1287_v33  ;;  %vm1173_vm14 = vweird.f32 %v2771_v3  ;;  %v1291_v3 = vld [vmem:[%s3446_s6 + $0x10] sm:$0xff] }
 0x20d   : > { %v1078_v63 = vsel %vm1076_vm10, %v1077_v9, %v2511_v36  ;;  %v1183_v13 = vsel %vm1176_vm3, %v1179_v1, %v1182_v38  ;;  %v3480_v49 = vmov 0.0   ;;  %vm1527_vm4 = vcmask 261120   ;;  %v1510_v38 = vpop.permute.xlu1 %1509 }
 0x20e   : > { %v1075_v27 = vsel %vm1073_vm11, %v2509_v23, %v1074_v17  ;;  %v1184_v24 = vsel %vm1173_vm14, nan, %v1183_v13  ;;  %vm2184_vm5 = vcmp.lt.s32.totalorder %v2729_v37, 3 }
 0x20f   : > { %v1079_v29 = vsel %vm1072_vm12, %v1075_v27, %v1078_v63 }
 0x210   : > { %v1080_v0 = vsel %vm1069_vm2, nan, %v1079_v29  ;;  %vm1345_vm2 = vcmask 195584   ;;  %v1500_v29 = vld [vmem:[%s3447_s7 + $0x8] sm:$0xff] }
 0x211   : > { %v2381_v18 = vpack.c.bf16 %v1080_v0, %v872_v26  ;;  %v1501_v0 = vld [vmem:[%s3447_s7 + $0x10] sm:$0xff] }
 0x213   : > { %2382 = vmatprep.subr.bf16.mxu1 %v2381_v18  ;;  %v1502_v18 = vld [vmem:[%s3447_s7 + $0x18] sm:$0xff] }
 0x214   : > { %2384 = vmatpush1.bf16.msra.mxu1 %v2383_v5 }
 0x215   : > { %1374 = vmatprep.subr.mxu1 %v1288_v2  ;;  %v1515_v2 = vpop.permute.xlu0 %1514 }
 0x218   : > { %1375 = vmatpush1.msra.mxu1 %v1184_v24 }
 0x219   : > { %2333 = vmatmul.mubr.msk.f32.vlgmr.msra.gmra.mrb[2].mxu1 %vm1345_vm2, %v1289_v53 }
 0x21a   : > { %1440 = vmatprep.mubr.f32.mxu1 %v3480_v49 }
 0x21d   : > { %2334 = vmatmul.mubr.msk.f32.gmra.mrb[4].mxu1 %vm1345_vm2, %v1290_v7 }
 0x21e   : > { %1446 = vmatprep.mubr.f32.mxu1 %v3480_v49 }
 0x221   : > { %2335 = vmatmul.mubr.msk.f32.gmra.mrb[6].mxu1 %vm1345_vm2, %v1291_v3 }
 0x222   : > { %1452 = vmatprep.mubr.f32.mxu1 %v3480_v49 }
 0x225   : > { %2336 = vmatmul.mubr.msk.f32.gmra.mrb[8].mxu1 %vm1345_vm2, %v1292_v58 }
 0x226   : > { %1458 = vmatprep.mubr.f32.mxu1 %v3480_v49 }
 0x229   : > { %2337 = vmatmul.mubr.msk.f32.gmra.mrb[10].mxu1 %vm1345_vm2, %v1293_v40 }
 0x22a   : > { %1464 = vmatprep.mubr.f32.mxu1 %v3480_v49 }
 0x22d   : > { %2338 = vmatmul.mubr.msk.f32.gmra.mrb[12].mxu1 %vm1345_vm2, %v1294_v30 }
 0x22e   : > { %1470 = vmatprep.mubr.f32.mxu1 %v3480_v49 }
 0x231   : > { %2339 = vmatmul.mubr.msk.f32.gmra.mrb[14].mxu1 %vm1345_vm2, %v1295_v43 }
 0x232   : > { %1476 = vmatprep.mubr.f32.mxu1 %v3480_v49 }
 0x235   : > { %2340 = vmatmul.mubr.msk.f32.gmra.mrb[16].mxu1 %vm1345_vm2, %v1296_v14 }
 0x236   : > { %1888 = vmatprep.mubr.f32.mxu1 %v3480_v49 }
 0x2ec   : > { %v1436_v56 = vpop.f32.mrb[2].mxu1 }
 0x2ed   : > { %v1438_v19 = vpop.f32.mrb[3].mxu1  ;;  %v1437_v46 = vadd.f32 %v1436_v56, %v1308_v55 }
 0x2ee   : > { %v1439_v51 = vadd.f32 %v1438_v19, %v1308_v55  ;;  %v1520_v55 = vpop.permute.xlu1 %1519 }
 0x2ef   : > { %v1483_v16 = vmax.f32 %v1437_v46, 0.0 }
 0x2f0   : > { %v1442_v32 = vpop.f32.mrb[4].mxu1  ;;  %v1484_v48 = vmax.f32 %v1439_v51, 0.0  ;;  %v1525_v51 = vpop.permute.xlu0 %1524 }
 0x2f1   : > { %v1443_v41 = vadd.f32 %v1442_v32, %v1313_v25  ;;  %v1444_v6 = vpop.f32.mrb[5].mxu1 }
 0x2f2   : > { %v1445_v8 = vadd.f32 %v1444_v6, %v1313_v25 }
 0x2f3   : > { %v1485_v42 = vmax.f32 %v1443_v41, 0.0 }
 0x2f4   : > { %v1486_v12 = vmax.f32 %v1445_v8, 0.0  ;;  %v1448_v21 = vpop.f32.mrb[6].mxu1 }
 0x2f5   : > { %v2387_v28 = vpack.c.bf16 %v1485_v42, %v1483_v16  ;;  %v1450_v11 = vpop.f32.mrb[7].mxu1  ;;  %v1449_v34 = vadd.f32 %v1448_v21, %v1318_v20 }
 0x2f6   : > { %v2385_v47 = vpack.c.bf16 %v1486_v12, %v1484_v48  ;;  %v1451_v4 = vadd.f32 %v1450_v11, %v1318_v20  ;;  %v2345_v20 = vld [vmem:[%s3447_s7 + $0x20] sm:$0xff] }
 0x2f7   : > { %v1487_v31 = vmax.f32 %v1449_v34, 0.0  ;;  %v2347_v34 = vld [vmem:[%s3447_s7 + $0x30] sm:$0xff] }
 0x2f8   : > { %v1454_v50 = vpop.f32.mrb[8].mxu1  ;;  %2386 = vmatprep.subr.bf16.mxu0 %v2385_v47  ;;  %v1488_v9 = vmax.f32 %v1451_v4, 0.0  ;;  %v2346_v47 = vld [vmem:[%s3447_s7 + $0x28] sm:$0xff]  ;;  %v1328_v4 = vpop.permute.xlu1 %1327 }
 0x2f9   : > { %v1455_v23 = vadd.f32 %v1454_v50, %v1323_v62  ;;  %v1456_v39 = vpop.f32.mrb[9].mxu1  ;;  %2388 = vmatpush1.bf16.msra.mxu0 %v2387_v28  ;;  %v1333_v50 = vpop.permute.xlu0 %1332 }
 0x2fa   : > { %v1457_v57 = vadd.f32 %v1456_v39, %v1323_v62  ;;  %v2348_v62 = vld [vmem:[%s3447_s7 + $0x38] sm:$0xff] }
 0x2fb   : > { %v1489_v36 = vmax.f32 %v1455_v23, 0.0 }
 0x2fc   : > { %v1490_v17 = vmax.f32 %v1457_v57, 0.0  ;;  %v3314_v61 = vpop.f32.mrb[10].mxu1  ;;  %v1650_v23 = vpop.permute.xlu1 %1649 }
 0x2fd   : > { %v2391_v10 = vpack.c.bf16 %v1489_v36, %v1487_v31  ;;  %v3316_v63 = vpop.f32.mrb[11].mxu1  ;;  %v1461_v39 = vadd.f32 %v3314_v61, %v1328_v4  ;;  %v1655_v57 = vpop.permute.xlu0 %1654 }
 0x2fe   : > { %v2389_v52 = vpack.c.bf16 %v1490_v17, %v1488_v9  ;;  %v1463_v31 = vadd.f32 %v3316_v63, %v1328_v4 }
 0x300   : > { %v3318_v44 = vpop.f32.mrb[12].mxu1  ;;  %2390 = vmatprep.subr.bf16.mxu0 %v2389_v52 }
 0x301   : > { %v3320_v27 = vpop.f32.mrb[13].mxu1  ;;  %2392 = vmatpush1.bf16.msra.mxu0 %v2391_v10  ;;  %v1338_v10 = vpop.permute.xlu1 %1337 }
 0x304   : > { %v3325_v15 = vpop.f32.mrb[14].mxu1  ;;  %2341 = vmatmul.mubr.msk.f32.vlgmr.msra.gmra.mrb[4].mxu0 %vm1527_vm4, %v1499_v35  ;;  %v1491_v35 = vmax.f32 %v1461_v39, 0.0  ;;  %v1786_v39 = vld [vmem:[%s3449_s9 + $0x10] sm:$0xff] }
 0x305   : > { %v3328_v26 = vpop.f32.mrb[15].mxu1  ;;  %1610 = vmatprep.mubr.f32.mxu0 %v3480_v49 }
 0x308   : > { %v3334_v45 = vpop.f32.mrb[16].mxu1  ;;  %2342 = vmatmul.mubr.msk.f32.gmra.mrb[6].mxu0 %vm1527_vm4, %v1500_v29  ;;  %v1467_v29 = vadd.f32 %v3318_v44, %v1333_v50  ;;  %v1475_v44 = vadd.f32 %v3328_v26, %v1338_v10 }
 0x309   : > { %v3337_v22 = vpop.f32.mrb[17].mxu1  ;;  %1616 = vmatprep.mubr.f32.mxu0 %v3480_v49 }
 0x30c   : > { %2343 = vmatmul.mubr.msk.f32.gmra.mrb[8].mxu0 %vm1527_vm4, %v1501_v0 }
 0x30d   : > { %1622 = vmatprep.mubr.f32.mxu0 %v3480_v49 }
 0x310   : > { %2344 = vmatmul.mubr.msk.f32.gmra.mrb[10].mxu0 %vm1527_vm4, %v1502_v18  ;;  %v1492_v18 = vmax.f32 %v1463_v31, 0.0 }
 0x311   : > { %1743 = vmatprep.mubr.f32.mxu0 %v3480_v49 }
 0x3d7   : > { %v1606_v33 = vpop.f32.mrb[4].mxu0 }
 0x3d8   : > { %v1608_v1 = vpop.f32.mrb[5].mxu0  ;;  %v1607_v5 = vadd.f32 %v1606_v33, %v1510_v38  ;;  %v1469_v33 = vadd.f32 %v3320_v27, %v1333_v50 }
 0x3d9   : > { %v1609_v13 = vadd.f32 %v1608_v1, %v1510_v38 }
 0x3da   : > { %v1629_v58 = vmax.f32 %v1607_v5, 0.0 }
 0x3db   : > { %v1612_v53 = vpop.f32.mrb[6].mxu0  ;;  %v1630_v30 = vmax.f32 %v1609_v13, 0.0  ;;  %v1343_v13 = vpop.permute.xlu0 %1342 }
 0x3dc   : > { %v1613_v24 = vadd.f32 %v1612_v53, %v1515_v2  ;;  %v1614_v7 = vpop.f32.mrb[7].mxu0 }
 0x3dd   : > { %v1615_v3 = vadd.f32 %v1614_v7, %v1515_v2  ;;  %v1473_v7 = vadd.f32 %v3325_v15, %v1338_v10  ;;  %v1481_v15 = vadd.f32 %v3337_v22, %v1343_v13  ;;  %v1784_v22 = vld [vmem:[%s3449_s9] sm:$0xff] }
 0x3de   : > { %v1631_v40 = vmax.f32 %v1613_v24, 0.0  ;;  %v1493_v24 = vmax.f32 %v1467_v29, 0.0 }
 0x3df   : > { %v1632_v43 = vmax.f32 %v1615_v3, 0.0  ;;  %v1618_v14 = vpop.f32.mrb[8].mxu0 }
 0x3e0   : > { %v2395_v56 = vpack.c.bf16 %v1631_v40, %v1629_v58  ;;  %v1620_v19 = vpop.f32.mrb[9].mxu0  ;;  %v1619_v25 = vadd.f32 %v1618_v14, %v1520_v55  ;;  %v1660_v58 = vpop.permute.xlu1 %1659  ;;  %v1494_v40 = vmax.f32 %v1469_v33, 0.0 }
 0x3e1   : > { %v2393_v46 = vpack.c.bf16 %v1632_v43, %v1630_v30  ;;  %v1621_v32 = vadd.f32 %v1620_v19, %v1520_v55 }
 0x3e2   : > { %v1633_v42 = vmax.f32 %v1619_v25, 0.0  ;;  %v1479_v25 = vadd.f32 %v3334_v45, %v1343_v13 }
 0x3e3   : > { %v1624_v41 = vpop.f32.mrb[10].mxu0  ;;  %2394 = vmatprep.subr.bf16.mxu0 %v2393_v46  ;;  %v1634_v12 = vmax.f32 %v1621_v32, 0.0  ;;  %v1495_v46 = vmax.f32 %v1473_v7, 0.0 }
 0x3e4   : > { %v1625_v6 = vadd.f32 %v1624_v41, %v1525_v51  ;;  %v1626_v8 = vpop.f32.mrb[11].mxu0  ;;  %2396 = vmatpush1.bf16.msra.mxu0 %v2395_v56  ;;  %v1665_v41 = vpop.permute.xlu0 %1664 }
 0x3e5   : > { %v1627_v16 = vadd.f32 %v1626_v8, %v1525_v51 }
 0x3e6   : > { %v1635_v48 = vmax.f32 %v1625_v6, 0.0  ;;  %v1496_v6 = vmax.f32 %v1475_v44, 0.0 }
 0x3e7   : > { %v1636_v21 = vmax.f32 %v1627_v16, 0.0 }
 0x3e8   : > { %v2399_v28 = vpack.c.bf16 %v1635_v48, %v1633_v42  ;;  %v1800_v10 = vpop.permute.xlu0 %1799 }
 0x3e9   : > { %v2397_v11 = vpack.c.bf16 %v1636_v21, %v1634_v12 }
 0x3eb   : > { %2398 = vmatprep.subr.bf16.mxu0 %v2397_v11  ;;  %v1497_v11 = vmax.f32 %v1479_v25, 0.0  ;;  %v2362_v25 = vld [vmem:[%s3449_s9 + $0x28] sm:$0xff] }
 0x3ec   : > { %2400 = vmatpush1.bf16.msra.mxu0 %v2399_v28  ;;  %v1810_v7 = vpop.permute.xlu0 %1809 }
 0x3ef   : > { %2353 = vmatmul.mubr.msk.f32.vlgmr.msra.gmra.mrb[12].mxu0 %vm1527_vm4, %v2345_v20 }
 0x3f0   : > { %1749 = vmatprep.mubr.f32.mxu0 %v3480_v49 }
 0x3f3   : > { %2354 = vmatmul.mubr.msk.f32.gmra.mrb[14].mxu0 %vm1527_vm4, %v2346_v47  ;;  %v1498_v47 = vmax.f32 %v1481_v15, 0.0 }
 0x3f4   : > { %1755 = vmatprep.mubr.f32.mxu0 %v3480_v49 }
 0x3f7   : > { %2355 = vmatmul.mubr.msk.f32.gmra.mrb[16].mxu0 %vm1527_vm4, %v2347_v34 }
 0x3f8   : > { %1761 = vmatprep.mubr.f32.mxu0 %v3480_v49 }
 0x3fb   : > { %2356 = vmatmul.mubr.msk.f32.gmra.mrb[18].mxu0 %vm1527_vm4, %v2348_v62 }
 0x3fc   : > { %2027 = vmatprep.mubr.f32.mxu0 %v3480_v49 }
 0x4c2   : > { %v1745_v36 = vpop.f32.mrb[12].mxu0 }
 0x4c3   : > { %v1746_v9 = vadd.f32 %v1745_v36, %v1650_v23  ;;  %v1747_v17 = vpop.f32.mrb[13].mxu0 }
 0x4c4   : > { %v1748_v52 = vadd.f32 %v1747_v17, %v1650_v23  ;;  %v1785_v23 = vld [vmem:[%s3449_s9 + $0x8] sm:$0xff] }
 0x4c5   : > { %v1768_v0 = vmax.f32 %v1746_v9, 0.0  ;;  %v1795_v9 = vpop.permute.xlu1 %1794 }
 0x4c6   : > { %v1769_v1 = vmax.f32 %v1748_v52, 0.0  ;;  %v1751_v38 = vpop.f32.mrb[14].mxu0 }
 0x4c7   : > { %v1776_v5 = vadd.f32 %v1768_v0, %v1491_v35  ;;  %v1752_v2 = vadd.f32 %v1751_v38, %v1655_v57  ;;  %v1753_v61 = vpop.f32.mrb[15].mxu0 }
 0x4c8   : > { %v1777_v53 = vadd.f32 %v1769_v1, %v1492_v18  ;;  %v1754_v63 = vadd.f32 %v1753_v61, %v1655_v57  ;;  %v1787_v57 = vld [vmem:[%s3449_s9 + $0x18] sm:$0xff] }
 0x4c9   : > { %v1770_v3 = vmax.f32 %v1752_v2, 0.0 }
 0x4ca   : > { %v1771_v30 = vmax.f32 %v1754_v63, 0.0  ;;  %v1757_v43 = vpop.f32.mrb[16].mxu0 }
 0x4cb   : > { %v1778_v14 = vadd.f32 %v1770_v3, %v1493_v24  ;;  %v1758_v27 = vadd.f32 %v1757_v43, %v1660_v58  ;;  %v1759_v56 = vpop.f32.mrb[17].mxu0 }
 0x4cc   : > { %v1779_v19 = vadd.f32 %v1771_v30, %v1494_v40  ;;  %v1760_v55 = vadd.f32 %v1759_v56, %v1660_v58 }
 0x4cd   : > { %v2403_v51 = vpack.c.bf16 %v1778_v14, %v1776_v5  ;;  %v1772_v32 = vmax.f32 %v1758_v27, 0.0 }
 0x4ce   : > { %v1773_v8 = vmax.f32 %v1760_v55, 0.0  ;;  %v1763_v16 = vpop.f32.mrb[18].mxu0  ;;  %v2401_v42 = vpack.c.bf16 %v1779_v19, %v1777_v53  ;;  %v1805_v53 = vpop.permute.xlu1 %1804 }
 0x4cf   : > { %v1780_v26 = vadd.f32 %v1772_v32, %v1495_v46  ;;  %v1764_v48 = vadd.f32 %v1763_v16, %v1665_v41  ;;  %v1765_v12 = vpop.f32.mrb[19].mxu0  ;;  %v2361_v46 = vld [vmem:[%s3449_s9 + $0x20] sm:$0xff]  ;;  %v2364_v32 = vld [vmem:[%s3449_s9 + $0x38] sm:$0xff]  ;;  %v1939_v16 = vpop.permute.xlu0 %1938 }
 0x4d0   : > { %v1781_v21 = vadd.f32 %v1773_v8, %v1496_v6  ;;  %v1766_v28 = vadd.f32 %v1765_v12, %v1665_v41  ;;  %2402 = vmatprep.subr.bf16.mxu1 %v2401_v42 }
 0x4d1   : > { %v1774_v20 = vmax.f32 %v1764_v48, 0.0  ;;  %2404 = vmatpush1.bf16.msra.mxu1 %v2403_v51  ;;  %v2363_v51 = vld [vmem:[%s3449_s9 + $0x30] sm:$0xff] }
 0x4d2   : > { %v1775_v45 = vmax.f32 %v1766_v28, 0.0  ;;  %v1934_v15 = vpop.permute.xlu1 %1933 }
 0x4d3   : > { %v1782_v34 = vadd.f32 %v1774_v20, %v1497_v11 }
 0x4d4   : > { %v1783_v62 = vadd.f32 %v1775_v45, %v1498_v47 }
 0x4d5   : > { %v2407_v4 = vpack.c.bf16 %v1782_v34, %v1780_v26 }
 0x4d6   : > { %v2405_v50 = vpack.c.bf16 %v1783_v62, %v1781_v21  ;;  %v1944_v62 = vpop.permute.xlu1 %1943 }
 0x4d8   : > { %2406 = vmatprep.subr.bf16.mxu1 %v2405_v50 }
 0x4d9   : > { %2408 = vmatpush1.bf16.msra.mxu1 %v2407_v4 }
 0x4dc   : > { %2357 = vmatmul.mubr.msk.f32.vlgmr.msra.gmra.mrb[18].mxu1 %vm1527_vm4, %v1784_v22  ;;  %v1949_v22 = vpop.permute.xlu0 %1948 }
 0x4dd   : > { %1894 = vmatprep.mubr.f32.mxu1 %v3480_v49 }
 0x4e0   : > { %2358 = vmatmul.mubr.msk.f32.gmra.mrb[20].mxu1 %vm1527_vm4, %v1785_v23 }
 0x4e1   : > { %1900 = vmatprep.mubr.f32.mxu1 %v3480_v49 }
 0x4e4   : > { %2359 = vmatmul.mubr.msk.f32.gmra.mrb[22].mxu1 %vm1527_vm4, %v1786_v39 }
 0x4e5   : > { %1906 = vmatprep.mubr.f32.mxu1 %v3480_v49 }
 0x4e8   : > { %2360 = vmatmul.mubr.msk.f32.gmra.mrb[24].mxu1 %vm1527_vm4, %v1787_v57 }
 0x4e9   : > { %2134 = vmatprep.mubr.f32.mxu1 %v3480_v49 }
 0x5af   : > { %v1890_v31 = vpop.f32.mrb[18].mxu1 }
 0x5b0   : > { %v1892_v36 = vpop.f32.mrb[19].mxu1  ;;  %v1891_v17 = vadd.f32 %v1890_v31, %v1795_v9 }
 0x5b1   : > { %v1893_v52 = vadd.f32 %v1892_v36, %v1795_v9 }
 0x5b2   : > { %v1913_v33 = vmax.f32 %v1891_v17, 0.0 }
 0x5b3   : > { %v1896_v35 = vpop.f32.mrb[20].mxu1  ;;  %v1914_v38 = vmax.f32 %v1893_v52, 0.0 }
 0x5b4   : > { %v1897_v29 = vadd.f32 %v1896_v35, %v1800_v10  ;;  %v1898_v0 = vpop.f32.mrb[21].mxu1 }
 0x5b5   : > { %v1899_v18 = vadd.f32 %v1898_v0, %v1800_v10  ;;  %v2060_v0 = vld [vmem:[%s3451_s11] sm:$0xf] }
 0x5b6   : > { %v1915_v1 = vmax.f32 %v1897_v29, 0.0 }
 0x5b7   : > { %v1916_v5 = vmax.f32 %v1899_v18, 0.0  ;;  %v1902_v2 = vpop.f32.mrb[22].mxu1  ;;  %v2065_v18 = vpop.permute.xlu1 %2064 }
 0x5b8   : > { %v2411_v61 = vpack.c.bf16 %v1915_v1, %v1913_v33  ;;  %v1904_v13 = vpop.f32.mrb[23].mxu1  ;;  %v1903_v24 = vadd.f32 %v1902_v2, %v1805_v53 }
 0x5b9   : > { %v2409_v63 = vpack.c.bf16 %v1916_v5, %v1914_v38  ;;  %v1905_v3 = vadd.f32 %v1904_v13, %v1805_v53 }
 0x5ba   : > { %v1917_v43 = vmax.f32 %v1903_v24, 0.0 }
 0x5bb   : > { %v1908_v58 = vpop.f32.mrb[24].mxu1  ;;  %2410 = vmatprep.subr.bf16.mxu0 %v2409_v63  ;;  %v1918_v27 = vmax.f32 %v1905_v3, 0.0 }
 0x5bc   : > { %v1909_v40 = vadd.f32 %v1908_v58, %v1810_v7  ;;  %v1910_v44 = vpop.f32.mrb[25].mxu1  ;;  %2412 = vmatpush1.bf16.msra.mxu0 %v2411_v61 }
 0x5bd   : > { %v1911_v30 = vadd.f32 %v1910_v44, %v1810_v7 }
 0x5be   : > { %v1919_v14 = vmax.f32 %v1909_v40, 0.0 }
 0x5bf   : > { %v1920_v56 = vmax.f32 %v1911_v30, 0.0 }
 0x5c0   : > { %v2415_v19 = vpack.c.bf16 %v1919_v14, %v1917_v43 }
 0x5c1   : > { %v2413_v55 = vpack.c.bf16 %v1920_v56, %v1918_v27 }
 0x5c3   : > { %2414 = vmatprep.subr.bf16.mxu0 %v2413_v55  ;;  %v3481_v55 = vrot.slane %v2759_v59, %v2753_v54 }
 0x5c4   : > { %2416 = vmatpush1.bf16.msra.mxu0 %v2415_v19 }
 0x5c7   : > { %2369 = vmatmul.mubr.msk.f32.vlgmr.msra.gmra.mrb[20].mxu0 %vm1527_vm4, %v2361_v46 }
 0x5c8   : > { %2033 = vmatprep.mubr.f32.mxu0 %v3480_v49 }
 0x5cb   : > { %2370 = vmatmul.mubr.msk.f32.gmra.mrb[22].mxu0 %vm1527_vm4, %v2362_v25 }
 0x5cc   : > { %2039 = vmatprep.mubr.f32.mxu0 %v3480_v49 }
 0x5cf   : > { %2371 = vmatmul.mubr.msk.f32.gmra.mrb[24].mxu0 %vm1527_vm4, %v2363_v51 }
 0x5d0   : > { %2045 = vmatprep.mubr.f32.mxu0 %v3480_v49 }
 0x5d3   : > { %2372 = vmatmul.mubr.msk.f32.gmra.mrb[26].mxu0 %vm1527_vm4, %v2364_v32 }
 0x69a   : > { %v2029_v41 = vpop.f32.mrb[20].mxu0 }
 0x69b   : > { %v2031_v6 = vpop.f32.mrb[21].mxu0  ;;  %v2030_v8 = vadd.f32 %v2029_v41, %v1934_v15 }
 0x69c   : > { %v2032_v42 = vadd.f32 %v2031_v6, %v1934_v15 }
 0x69d   : > { %v2052_v28 = vmax.f32 %v2030_v8, 0.0 }
 0x69e   : > { %v2035_v26 = vpop.f32.mrb[22].mxu0  ;;  %v2053_v20 = vmax.f32 %v2032_v42, 0.0 }
 0x69f   : > { %v2036_v48 = vadd.f32 %v2035_v26, %v1939_v16  ;;  %v2037_v12 = vpop.f32.mrb[23].mxu0 }
 0x6a0   : > { %v2038_v21 = vadd.f32 %v2037_v12, %v1939_v16 }
 0x6a1   : > { %v2054_v11 = vmax.f32 %v2036_v48, 0.0 }
 0x6a2   : > { %v2055_v49 = vmax.f32 %v2038_v21, 0.0  ;;  %v2041_v47 = vpop.f32.mrb[24].mxu0 }
 0x6a3   : > { %v2419_v45 = vpack.c.bf16 %v2054_v11, %v2052_v28  ;;  %v2043_v34 = vpop.f32.mrb[25].mxu0  ;;  %v2042_v50 = vadd.f32 %v2041_v47, %v1944_v62 }
 0x6a4   : > { %v2417_v4 = vpack.c.bf16 %v2055_v49, %v2053_v20  ;;  %v2044_v23 = vadd.f32 %v2043_v34, %v1944_v62 }
 0x6a5   : > { %v2056_v9 = vmax.f32 %v2042_v50, 0.0 }
 0x6a6   : > { %v2047_v39 = vpop.f32.mrb[26].mxu0  ;;  %2418 = vmatprep.subr.bf16.mxu1 %v2417_v4  ;;  %v2057_v10 = vmax.f32 %v2044_v23, 0.0 }
 0x6a7   : > { %v2048_v57 = vadd.f32 %v2047_v39, %v1949_v22  ;;  %v2049_v31 = vpop.f32.mrb[27].mxu0  ;;  %2420 = vmatpush1.bf16.msra.mxu1 %v2419_v45 }
 0x6a8   : > { %v2050_v36 = vadd.f32 %v2049_v31, %v1949_v22 }
 0x6a9   : > { %v2058_v17 = vmax.f32 %v2048_v57, 0.0 }
 0x6aa   : > { %v2059_v52 = vmax.f32 %v2050_v36, 0.0 }
 0x6ab   : > { %v2423_v35 = vpack.c.bf16 %v2058_v17, %v2056_v9 }
 0x6ac   : > { %v2421_v29 = vpack.c.bf16 %v2059_v52, %v2057_v10 }
 0x6ae   : > { %2422 = vmatprep.subr.bf16.mxu1 %v2421_v29 }
 0x6af   : > { %2424 = vmatpush1.bf16.msra.mxu1 %v2423_v35 }
 0x6b2   : > { %2373 = vmatmul.mubr.msk.f32.vlgmr.msra.gmra.mrb[26].mxu1 %vm1527_vm4, %v2060_v0 }
 0x785   : > { %v2136_v33 = vpop.f32.mrb[26].mxu1 }
 0x786   : > { %v2137_v1 = vadd.f32 %v2136_v33, %v2065_v18  ;;  %v2138_v38 = vpop.f32.mrb[27].mxu1 }
 0x787   : > { %v2139_v5 = vadd.f32 %v2138_v38, %v2065_v18 }
 0x788   : > { %v2141_v2 = vsub.f32 0.0, %v2137_v1  ;;  %v2374_v61 = vadd.f32 -1.0, %v2137_v1 }
 0x789   : > { %v2142_v13 = vsub.f32 0.0, %v2139_v5  ;;  %v2375_v53 = vadd.f32 -1.0, %v2139_v5 }
 0x78a   : > { %v2143_v63 = vmul.f32 1.442695, %v2141_v2  ;;  %v2155_v24 = vmin.f32 %v2374_v61, 80.0 }
 0x78b   : > { %v2145_v7 = vmul.f32 1.442695, %v2142_v13  ;;  %v2156_v3 = vmin.f32 %v2375_v53, 80.0 }
 0x78c   : > { %2512 = vpow2.f32 %v2143_v63  ;;  %v2157_v58 = vmul.f32 1.442695, %v2155_v24 }
 0x78d   : > { %2514 = vpow2.f32 %v2145_v7  ;;  %v2159_v40 = vmul.f32 1.442695, %v2156_v3 }
 0x78e   : > { %2516 = vpow2.f32 %v2157_v58 }
 0x78f   : > { %2518 = vpow2.f32 %v2159_v40 }
 0x796   : > { %v2513_v44 = vpop.eup %2512 }
 0x797   : > { %v2515_v30 = vpop.eup %2514  ;;  %v2147_v43 = vadd.f32 1.0, %v2513_v44 }
 0x798   : > { %v2517_v14 = vpop.eup %2516  ;;  %v2148_v27 = vadd.f32 1.0, %v2515_v30 }
 0x799   : > { %v2519_v56 = vpop.eup %2518  ;;  %2520 = vrcp.f32 %v2147_v43  ;;  %v2180_v19 = vmul.f32 %v2517_v14, %v2762_v60 }
 0x79a   : > { %2522 = vrcp.f32 %v2148_v27  ;;  %v2181_v46 = vmul.f32 %v2519_v56, %v3481_v55 }
 0x7a3   : > { %v2521_v25 = vpop.eup %2520 }
 0x7a4   : > { %v2523_v51 = vpop.eup %2522  ;;  %v2185_v32 = vsel %vm2184_vm5, %v2521_v25, %v2180_v19 }
 0x7a5   : > { %v2186_v41 = vsel %vm2184_vm5, %v2523_v51, %v2181_v46 }
 0x7a6   : > { %v2189_v6 = vcombine.low %v2185_v32, %v2186_v41 }
 0x7a8   : > { %2191 = vst [vmem:[%s498_s29] sm:$0xff] %v2189_v6 }
 0x7a9 PF: > { %s23_s27 = sadd.s32 1, %s2546_s27   ;;  %s3482_s25 = smov %s2542_s26 }
 0x7aa   : > { %p20_p5 = scmp.ge.s32.totalorder %s23_s27, 4   ;;  %s3483_s26 = smov %s3485_s28 }
 0x7ac   :  { %22 = sbr.rel (!%p20_p5) target bundleno = 2 (0x2), region = 109 }

</bundles_post_ra>
